<compile_context>
chip_gen: v5e
topology: v5e:2x2
jax: 0.10.0
libtpu: 0.0.40
codegen_flags: <defaults>
</compile_context>

<pallas_src>
import numpy as np
import jax
import jax.numpy as jnp
from jax.experimental import pallas as pl
from jax.experimental.pallas import tpu as pltpu


# ----------------------------------------------------------------------------
# Fused kernel. Grid = (T,) sequential carry ("arbitrary"):
#   1) 3-hop GCN (only when this snapshot has selected in-edges; flags[t])
#   2) LSTMCell (computed for all rows, scattered to live-seed rows via mask)
#   3) clicked-user embedding collection via dynamic row reads (prefetched indices)
#   4) at t == T-1: block-diagonal candidate scoring + cross-entropy(label 0)
# ----------------------------------------------------------------------------
def gcrnn_fused_kernel(aslot_ref, flags_ref, clicks_ref,           # scalar prefetch (SMEM)
                       nemb_in_ref, cx_in_ref, rel_ref, a_ref, seedm_ref,
                       candsel_ref, kmask_ref, vmask_ref, w_ref, b_ref,
                       nemb_ref, cx_ref, loss_ref,
                       uacc_ref, xh_ref):
    t = pl.program_id(0)
    n_t = pl.num_programs(0)
    n_rows, dp = nemb_in_ref.shape
    n_cat = rel_ref.shape[0]
    mp = uacc_ref.shape[0]
    kp = candsel_ref.shape[0] // mp

    # ---- init carried state (VMEM-resident for the whole grid) ----
    @pl.when(t == 0)
    def _init():
        nemb_ref[...] = nemb_in_ref[...]
        cx_ref[...] = cx_in_ref[...]
        uacc_ref[...] = jnp.zeros_like(uacc_ref)

    h0 = nemb_ref[...]          # node emb entering this snapshot   (N, Dp) f32
    c_prev = cx_ref[...]        # cell state entering this snapshot (N, Dp) f32

    # ---- 3-hop GCN: agg[v] = mean over in-edges of (src_emb * rel[cat]) ----
    # 1/deg is pre-folded into the bf16 adjacency; messages always use the pre-GCN
    # node embeddings (matches the PyTorch reference: same agg for all 3 hops).
    @pl.when(flags_ref[t] > 0)
    def _gcn():
        rel = rel_ref[...]
        agg = jnp.zeros((n_rows, dp), jnp.float32)
        for c in range(n_cat):                                    # per-category bf16 MXU
            hc = (h0 * rel[c:c + 1, :]).astype(jnp.bfloat16)      # (N, Dp) bf16
            agg = agg + jnp.dot(a_ref[0, c], hc,
                                preferred_element_type=jnp.float32)
        h = h0
        for _ in range(3):
            h = jnp.maximum(h + agg, 0.0)
        nemb_ref[...] = h

    # ---- LSTMCell (PyTorch gate order i, f, g, o), fused K = 2*Dp bf16 matmul ----
    x = nemb_ref[...]                                             # post-GCN emb = input
    xh_ref[:, 0:dp] = x.astype(jnp.bfloat16)                      # staged [x ; h0] bf16
    xh_ref[:, dp:2 * dp] = h0.astype(jnp.bfloat16)
    gates = jnp.dot(xh_ref[...], w_ref[...],
                    preferred_element_type=jnp.float32) + b_ref[...]   # (N, 4*Dp) f32
    i_g = jax.nn.sigmoid(gates[:, 0:dp])
    f_g = jax.nn.sigmoid(gates[:, dp:2 * dp])
    g_g = jnp.tanh(gates[:, 2 * dp:3 * dp])
    o_g = jax.nn.sigmoid(gates[:, 3 * dp:4 * dp])
    c_new = f_g * c_prev + i_g * g_g
    h_new = o_g * jnp.tanh(c_new)

    seedm = seedm_ref[0]        # (N, 1): 1.0 for live-seed (user) rows at time t
    h_out = jnp.where(seedm > 0.0, h_new, x)
    c_out = jnp.where(seedm > 0.0, c_new, c_prev)
    nemb_ref[...] = h_out
    cx_ref[...] = c_out

    # ---- collect this snapshot's clicked-user embeddings (dynamic row reads) ----
    # clicks_ref[t, m] = node id of click m if it occurs at time t, else -1.
    # TODO(synk): for large click counts switch to a fori_loop over a per-t click count.
    for m in range(mp):
        idx = clicks_ref[t, m]

        @pl.when(idx >= 0)
        def _collect(m=m, idx=idx):
            uacc_ref[pl.ds(m, 1), :] = nemb_ref[pl.ds(idx, 1), :]

    # ---- final snapshot: block-diagonal candidate scoring + CE(label 0) ----
    @pl.when(t == n_t - 1)
    def _loss():
        nf = nemb_ref[...].astype(jnp.bfloat16)                   # (N, Dp) bf16
        cand = jnp.dot(candsel_ref[...], nf,
                       preferred_element_type=jnp.float32)        # (Mp*Kp, Dp) f32
        cand3 = cand.reshape(mp, kp, dp)                          # layout-preserving
        u = uacc_ref[...]                                         # (Mp, Dp) f32
        s = jnp.sum(u[:, None, :] * cand3, axis=-1)               # (Mp, Kp) logits
        s_masked = jnp.where(kmask_ref[...] > 0.0, s, -1e30)
        mrow = jnp.max(s_masked, axis=-1, keepdims=True)
        lse = mrow + jnp.log(jnp.sum(jnp.exp(s_masked - mrow),
                                     axis=-1, keepdims=True))
        pos = s[:, 0:1]                                           # label 0 = candidate 0
        # vmask carries the 1/n_clicks weight (0 on padded click rows)
        nll = (lse - pos) * vmask_ref[...]                        # (Mp, 1)
        loss_ref[...] = jnp.sum(nll, axis=0, keepdims=True)       # (1, 1)


def gcrnn_fused(a_slot, flags, clicks, node_emb, cx, rel, a_comp, seedm,
                candsel, kmask, vmask, w_cat, b):
    t_num = flags.shape[0]
    n, dp = node_emb.shape
    c = rel.shape[0]
    mk = candsel.shape[0]
    mp, kp = kmask.shape
    return pl.pallas_call(
        gcrnn_fused_kernel,
        out_shape=(
            jax.ShapeDtypeStruct((n, dp), jnp.float32),           # final node_emb
            jax.ShapeDtypeStruct((n, dp), jnp.float32),           # final cx
            jax.ShapeDtypeStruct((1, 1), jnp.float32),            # loss
        ),
        grid_spec=pltpu.PrefetchScalarGridSpec(
            num_scalar_prefetch=3,                                # a_slot, flags, clicks
            grid=(t_num,),
            in_specs=[
                pl.BlockSpec((n, dp), lambda t, sl, fl, ck: (0, 0)),        # node_emb init
                pl.BlockSpec((n, dp), lambda t, sl, fl, ck: (0, 0)),        # cx init
                pl.BlockSpec((c, dp), lambda t, sl, fl, ck: (0, 0)),        # rel (cat) emb
                # compacted bf16 adjacency; same slot on empty snapshots -> DMA skipped
                pl.BlockSpec((1, c, n, n), lambda t, sl, fl, ck: (sl[t], 0, 0, 0)),
                pl.BlockSpec((1, n, 1), lambda t, sl, fl, ck: (t, 0, 0)),   # live-seed mask
                pl.BlockSpec((mk, n), lambda t, sl, fl, ck: (0, 0)),        # candidate sel (bf16)
                pl.BlockSpec((mp, kp), lambda t, sl, fl, ck: (0, 0)),       # candidate mask
                pl.BlockSpec((mp, 1), lambda t, sl, fl, ck: (0, 0)),        # click weight (1/M)
                pl.BlockSpec((2 * dp, 4 * dp), lambda t, sl, fl, ck: (0, 0)),  # LSTM W (bf16)
                pl.BlockSpec((1, 4 * dp), lambda t, sl, fl, ck: (0, 0)),       # LSTM bias
            ],
            out_specs=[
                pl.BlockSpec((n, dp), lambda t, sl, fl, ck: (0, 0)),
                pl.BlockSpec((n, dp), lambda t, sl, fl, ck: (0, 0)),
                pl.BlockSpec((1, 1), lambda t, sl, fl, ck: (0, 0)),
            ],
            scratch_shapes=[
                pltpu.VMEM((mp, dp), jnp.float32),                # clicked-user emb acc
                pltpu.VMEM((n, 2 * dp), jnp.bfloat16),            # staged [x ; h0] bf16
            ],
        ),
        compiler_params=pltpu.CompilerParams(
            dimension_semantics=("arbitrary",),
            vmem_limit_bytes=48 * 1024 * 1024,
        ),
    )(a_slot, flags, clicks, node_emb, cx, rel, a_comp, seedm,
      candsel, kmask, vmask, w_cat, b)


# ----------------------------------------------------------------------------
# GCRNN forward: host glue mirrors seq_GCRNN_batch / forward() control flow,
# densifies the per-snapshot structure, then launches ONE fused kernel.
# ----------------------------------------------------------------------------
def gcrnn_forward(params, graph, user_batch, time_batch, ns_idx,
                  user_num, cat_num, snapshots_num, history_length=100,
                  d_pad=128):
    node_emb = np.asarray(params["node_emb"], np.float32)     # (N, D)
    cx0 = np.asarray(params["cx0"], np.float32)
    rel_emb = np.asarray(params["rel_emb"], np.float32)
    w_ih = np.asarray(params["W_ih"], np.float32)             # (4D, D)
    w_hh = np.asarray(params["W_hh"], np.float32)
    b_lstm = np.asarray(params["b_ih"], np.float32) + np.asarray(params["b_hh"], np.float32)

    n_nodes, d = node_emb.shape
    latest = snapshots_num - 1
    t_num = snapshots_num
    k_cand = ns_idx.shape[1]

    # ---- click bookkeeping (mirrors forward()) ----
    seed_list = [set() for _ in range(t_num)]
    seed_entid, train_t = [], []
    for time_list, user in zip(time_batch, user_batch):
        for t in time_list:
            seed_list[t].add(user)
            seed_entid.append(user)
            train_t.append(t)
    n_clicks = len(seed_entid)

    # ---- backward sweep: live seeds + selected 1-hop in-edges per time ----
    gcn_seed_per_time, gcn_edges_per_time = [], []
    future_needed = set()
    check_lifetime = np.zeros(user_num)
    for i in range(latest, -1, -1):
        if seed_list[i]:
            check_lifetime[list(seed_list[i])] = history_length
        future_needed = future_needed.union(seed_list[i])
        sel = [(u, v, c) for (u, v, c) in graph["sub_g"][i] if v in future_needed]
        gcn_seed_per_time.append(sorted(future_needed))
        gcn_edges_per_time.append(sel)
        check_lifetime[check_lifetime > 0] -= 1
        future_needed = future_needed - set(np.where(check_lifetime == 0)[0].tolist())

    # ---- densify + compact per-snapshot structure ----
    m_pad = max(8, ((n_clicks + 7) // 8) * 8)
    k_pad = max(8, ((k_cand + 7) // 8) * 8)

    a_full = np.zeros((t_num, cat_num, n_nodes, n_nodes), np.float32)   # per-cat adjacency
    a_slot = np.zeros((t_num,), np.int32)
    flags = np.zeros((t_num,), np.int32)
    seedm_all = np.zeros((t_num, n_nodes, 1), np.float32)
    clicks = np.full((t_num, m_pad), -1, np.int32)

    next_slot, last_slot = 0, 0
    for i in range(t_num):
        inverse = latest - i
        seeds = gcn_seed_per_time[inverse]
        edges = gcn_edges_per_time[inverse]
        if len(seeds) > 0:
            seedm_all[i, np.asarray(seeds, np.int64), 0] = 1.0
        if len(edges) > 0:
            flags[i] = 1
            deg = np.zeros((n_nodes,), np.float32)
            for (u, v, c) in edges:
                a_full[next_slot, c, v, u] += 1.0
                deg[v] += 1.0
            # fold 1/in-degree (mean over in-edges) into the adjacency rows
            a_full[next_slot] /= np.maximum(deg, 1.0)[None, :, None]
            a_slot[i] = next_slot
            last_slot = next_slot
            next_slot += 1
        else:
            a_slot[i] = last_slot        # unchanged block index -> DMA elided
    a_comp = a_full[:max(next_slot, 1)]

    for m, (u, tt) in enumerate(zip(seed_entid, train_t)):
        clicks[tt, m] = u                # click m reads user u's emb right after time tt

    # ---- candidate selector (block-diagonal layout) + loss masks ----
    candsel = np.zeros((m_pad * k_pad, n_nodes), np.float32)
    kmask = np.zeros((m_pad, k_pad), np.float32)
    vmask = np.zeros((m_pad, 1), np.float32)
    kmask[:, :k_cand] = 1.0
    for m in range(n_clicks):
        vmask[m, 0] = 1.0 / float(max(n_clicks, 1))   # mean over clicks folded in here
        for k in range(k_cand):
            candsel[m * k_pad + k, user_num + int(ns_idx[m, k])] = 1.0

    # ---- lane-pad (last dim -> d_pad = 128); pad lanes stay exactly zero ----
    def pad_cols(x):
        out = np.zeros((x.shape[0], d_pad), np.float32)
        out[:, :x.shape[1]] = x
        return out

    node_pad = pad_cols(node_emb)
    cx_pad = pad_cols(cx0)
    rel_pad = pad_cols(rel_emb)

    # fused, padded LSTM weight: [x ; h] (2*Dp) -> 4 gate blocks of Dp each
    w_cat = np.zeros((2 * d_pad, 4 * d_pad), np.float32)
    b_pad = np.zeros((1, 4 * d_pad), np.float32)
    wih_t, whh_t = w_ih.T, w_hh.T                  # (D, 4D)
    for g in range(4):
        w_cat[:d, g * d_pad:g * d_pad + d] = wih_t[:, g * d:(g + 1) * d]
        w_cat[d_pad:d_pad + d, g * d_pad:g * d_pad + d] = whh_t[:, g * d:(g + 1) * d]
        b_pad[0, g * d_pad:g * d_pad + d] = b_lstm[g * d:(g + 1) * d]

    _, _, loss = gcrnn_fused(
        jnp.asarray(a_slot), jnp.asarray(flags), jnp.asarray(clicks),
        jnp.asarray(node_pad), jnp.asarray(cx_pad), jnp.asarray(rel_pad),
        jnp.asarray(a_comp, dtype=jnp.bfloat16),       # pre-normalized bf16 adjacency
        jnp.asarray(seedm_all),
        jnp.asarray(candsel, dtype=jnp.bfloat16),
        jnp.asarray(kmask), jnp.asarray(vmask),
        jnp.asarray(w_cat, dtype=jnp.bfloat16),        # bf16 LSTM weights (f32 accumulate)
        jnp.asarray(b_pad))
    return loss[0, 0]


# ----------------------------------------------------------------------------
# Driver
# ----------------------------------------------------------------------------
if __name__ == "__main__":
    USER_NUM, NEWS_NUM, CAT_NUM = 12, 20, 4
    EMB_DIM = 32          # real embedding dim (padded to 128 lanes inside)
    D_PAD = 128
    SNAPSHOTS = 4
    N_NODES = USER_NUM + NEWS_NUM
    K_CAND = 9
    HISTORY_LEN = 100

    key = jax.random.PRNGKey(0)
    ks = jax.random.split(key, 12)

    # --- deterministic "learned" parameters (synthetic, no checkpoint load) ---
    user_emb = 0.1 * jax.random.normal(ks[0], (USER_NUM, EMB_DIM), jnp.float32)
    news_emb = 0.1 * jax.random.normal(ks[1], (NEWS_NUM, EMB_DIM), jnp.float32)
    rel_emb = 0.1 * jax.random.normal(ks[2], (CAT_NUM, EMB_DIM), jnp.float32)
    cx0 = 0.1 * jax.random.normal(ks[3], (N_NODES, EMB_DIM), jnp.float32)

    s = 1.0 / np.sqrt(EMB_DIM)
    W_ih = jax.random.uniform(ks[4], (4 * EMB_DIM, EMB_DIM), jnp.float32, -s, s)
    W_hh = jax.random.uniform(ks[5], (4 * EMB_DIM, EMB_DIM), jnp.float32, -s, s)
    b_ih = jax.random.uniform(ks[6], (4 * EMB_DIM,), jnp.float32, -s, s)
    b_hh = jax.random.uniform(ks[7], (4 * EMB_DIM,), jnp.float32, -s, s)

    params = {
        "node_emb": np.asarray(jnp.concatenate([user_emb, news_emb], axis=0)),
        "cx0": np.asarray(cx0),
        "rel_emb": np.asarray(rel_emb),
        "W_ih": np.asarray(W_ih),
        "W_hh": np.asarray(W_hh),
        "b_ih": np.asarray(b_ih),
        "b_hh": np.asarray(b_hh),
    }

    # --- deterministic synthetic graph snapshots: (src, dst, cat) edges ---
    sub_g = []
    for t in range(SNAPSHOTS):
        kt = jax.random.fold_in(ks[8], t)
        k_s, k_d, k_c = jax.random.split(kt, 3)
        E = 10
        src = np.asarray(jax.random.randint(k_s, (E,), USER_NUM, N_NODES))   # news -> user
        dst = np.asarray(jax.random.randint(k_d, (E,), 0, USER_NUM))
        cat = np.asarray(jax.random.randint(k_c, (E,), 0, CAT_NUM))
        edges = [(int(u), int(v), int(c)) for u, v, c in zip(src, dst, cat)]
        # also a user -> news edge (filtered out by the in_edges(users) selection)
        edges.append((0, USER_NUM + (t % NEWS_NUM), t % CAT_NUM))
        sub_g.append(edges)
    graph = {"sub_g": sub_g}

    # --- batch: clicks (user, time) and negative-sample candidate news ids ---
    user_batch = [0, 3, 5, 7]
    time_batch = [[0, 2], [1], [3], [0, 1]]
    num_clicks = sum(len(t) for t in time_batch)
    ns_idx = np.asarray(jax.random.randint(ks[9], (num_clicks, K_CAND), 0, NEWS_NUM))

    loss = gcrnn_forward(params, graph, user_batch, time_batch, ns_idx,
                         USER_NUM, CAT_NUM, SNAPSHOTS, HISTORY_LEN, D_PAD)
    loss = jax.block_until_ready(loss)
    assert np.isfinite(float(loss))
    print("KERNEL_OK")
</pallas_src>

<mosaic_0001>
module attributes {stable_mosaic.version = 11 : i64} {
  func.func @gcrnn_fused_kernel(%arg0: i32, %arg1: memref<4xi32, #tpu.memory_space<smem>>, %arg2: memref<4xi32, #tpu.memory_space<smem>>, %arg3: memref<4x8xi32, #tpu.memory_space<smem>>, %arg4: memref<32x128xf32, #tpu.memory_space<vmem>>, %arg5: memref<32x128xf32, #tpu.memory_space<vmem>>, %arg6: memref<4x128xf32, #tpu.memory_space<vmem>>, %arg7: memref<1x4x32x32xbf16, #tpu.memory_space<vmem>>, %arg8: memref<1x32x1xf32, #tpu.memory_space<vmem>>, %arg9: memref<128x32xbf16, #tpu.memory_space<vmem>>, %arg10: memref<8x16xf32, #tpu.memory_space<vmem>>, %arg11: memref<8x1xf32, #tpu.memory_space<vmem>>, %arg12: memref<256x512xbf16, #tpu.memory_space<vmem>>, %arg13: memref<1x512xf32, #tpu.memory_space<vmem>>, %arg14: memref<32x128xf32, #tpu.memory_space<vmem>>, %arg15: memref<32x128xf32, #tpu.memory_space<vmem>>, %arg16: memref<1x1xf32, #tpu.memory_space<vmem>>, %arg17: memref<8x128xf32, #tpu.memory_space<vmem>>, %arg18: memref<32x256xbf16, #tpu.memory_space<vmem>>) attributes {dimension_semantics = [#tpu.dimension_semantics<arbitrary>], iteration_bounds = array<i64: 4>, scalar_prefetch = 3 : i64, scratch_operands = 2 : i64, tpu.core_type = #tpu.core_type<tc>, window_params = [{pipeline_mode = #tpu.pipeline_mode<synchronous>, transform_indices = @transform_0, window_bounds = array<i64: 32, 128>}, {pipeline_mode = #tpu.pipeline_mode<synchronous>, transform_indices = @transform_1, window_bounds = array<i64: 32, 128>}, {pipeline_mode = #tpu.pipeline_mode<synchronous>, transform_indices = @transform_2, window_bounds = array<i64: 4, 128>}, {transform_indices = @transform_3, window_bounds = array<i64: 1, 4, 32, 32>}, {transform_indices = @transform_4, window_bounds = array<i64: 1, 32, 1>}, {pipeline_mode = #tpu.pipeline_mode<synchronous>, transform_indices = @transform_5, window_bounds = array<i64: 128, 32>}, {pipeline_mode = #tpu.pipeline_mode<synchronous>, transform_indices = @transform_6, window_bounds = array<i64: 8, 16>}, {pipeline_mode = #tpu.pipeline_mode<synchronous>, transform_indices = @transform_7, window_bounds = array<i64: 8, 1>}, {pipeline_mode = #tpu.pipeline_mode<synchronous>, transform_indices = @transform_8, window_bounds = array<i64: 256, 512>}, {pipeline_mode = #tpu.pipeline_mode<synchronous>, transform_indices = @transform_9, window_bounds = array<i64: 1, 512>}, {pipeline_mode = #tpu.pipeline_mode<synchronous>, transform_indices = @transform_10, window_bounds = array<i64: 32, 128>}, {pipeline_mode = #tpu.pipeline_mode<synchronous>, transform_indices = @transform_11, window_bounds = array<i64: 32, 128>}, {pipeline_mode = #tpu.pipeline_mode<synchronous>, transform_indices = @transform_12, window_bounds = array<i64: 1, 1>}]} {
    %c0_i32 = arith.constant 0 : i32
    %0 = arith.cmpi eq, %arg0, %c0_i32 : i32
    %1 = arith.extui %0 : i1 to i32
    %c0_i32_0 = arith.constant 0 : i32
    %2 = arith.cmpi ne, %1, %c0_i32_0 : i32
    scf.if %2 {
      %c0_47 = arith.constant 0 : index
      %c0_48 = arith.constant 0 : index
      %103 = vector.load %arg4[%c0_47, %c0_48] : memref<32x128xf32, #tpu.memory_space<vmem>>, vector<32x128xf32>
      %c0_49 = arith.constant 0 : index
      %c0_50 = arith.constant 0 : index
      %104 = vector.load %arg14[%c0_49, %c0_50] : memref<32x128xf32, #tpu.memory_space<vmem>>, vector<32x128xf32>
      tpu.vector_store %arg14[%c0_49, %c0_50], %103 {strides = array<i32>} : memref<32x128xf32, #tpu.memory_space<vmem>>, vector<32x128xf32>,
      %c0_51 = arith.constant 0 : index
      %c0_52 = arith.constant 0 : index
      %105 = vector.load %arg5[%c0_51, %c0_52] : memref<32x128xf32, #tpu.memory_space<vmem>>, vector<32x128xf32>
      %c0_53 = arith.constant 0 : index
      %c0_54 = arith.constant 0 : index
      %106 = vector.load %arg15[%c0_53, %c0_54] : memref<32x128xf32, #tpu.memory_space<vmem>>, vector<32x128xf32>
      tpu.vector_store %arg15[%c0_53, %c0_54], %105 {strides = array<i32>} : memref<32x128xf32, #tpu.memory_space<vmem>>, vector<32x128xf32>,
      %cst_55 = arith.constant 0.000000e+00 : f32
      %107 = vector.broadcast %cst_55 : f32 to vector<8x128xf32>
      %c0_56 = arith.constant 0 : index
      %c0_57 = arith.constant 0 : index
      %108 = vector.load %arg17[%c0_56, %c0_57] : memref<8x128xf32, #tpu.memory_space<vmem>>, vector<8x128xf32>
      tpu.vector_store %arg17[%c0_56, %c0_57], %107 {strides = array<i32>} : memref<8x128xf32, #tpu.memory_space<vmem>>, vector<8x128xf32>,
    } else {
    }
    %c0 = arith.constant 0 : index
    %c0_1 = arith.constant 0 : index
    %3 = vector.load %arg14[%c0, %c0_1] : memref<32x128xf32, #tpu.memory_space<vmem>>, vector<32x128xf32>
    %c0_2 = arith.constant 0 : index
    %c0_3 = arith.constant 0 : index
    %4 = vector.load %arg15[%c0_2, %c0_3] : memref<32x128xf32, #tpu.memory_space<vmem>>, vector<32x128xf32>
    %5 = arith.index_cast %arg0 : i32 to index
    %6 = memref.load %arg2[%5] : memref<4xi32, #tpu.memory_space<smem>>
    %c0_i32_4 = arith.constant 0 : i32
    %7 = arith.cmpi sgt, %6, %c0_i32_4 : i32
    %8 = arith.extui %7 : i1 to i32
    %c0_i32_5 = arith.constant 0 : i32
    %9 = arith.cmpi ne, %8, %c0_i32_5 : i32
    scf.if %9 {
      %c0_47 = arith.constant 0 : index
      %c0_48 = arith.constant 0 : index
      %103 = vector.load %arg6[%c0_47, %c0_48] : memref<4x128xf32, #tpu.memory_space<vmem>>, vector<4x128xf32>
      %cst_49 = arith.constant 0.000000e+00 : f32
      %104 = vector.broadcast %cst_49 : f32 to vector<32x128xf32>
      %105 = vector.extract_strided_slice %103 {offsets = [0, 0], sizes = [1, 128], strides = [1, 1]} : vector<4x128xf32> to vector<1x128xf32>
      %106 = vector.broadcast %105 : vector<1x128xf32> to vector<32x128xf32>
      %107 = arith.mulf %3, %106 : vector<32x128xf32>
      %108 = arith.truncf %107 : vector<32x128xf32> to vector<32x128xbf16>
      %c0_50 = arith.constant 0 : index
      %c0_51 = arith.constant 0 : index
      %c0_52 = arith.constant 0 : index
      %c0_53 = arith.constant 0 : index
      %109 = vector.load %arg7[%c0_50, %c0_51, %c0_52, %c0_53] : memref<1x4x32x32xbf16, #tpu.memory_space<vmem>>, vector<1x1x32x32xbf16>
      %110 = vector.shape_cast %109 : vector<1x1x32x32xbf16> to vector<32x32xbf16>
      %cst_54 = arith.constant dense<0.000000e+00> : vector<32x128xf32>
      %111 = tpu.matmul %110, %108, %cst_54 {dimension_numbers = #tpu.dot_dimension_numbers<[1], [0], [0], [1], [0, 0, 1, 1], [], []>} : vector<32x32xbf16>, vector<32x128xbf16>, vector<32x128xf32> -> vector<32x128xf32>
      %112 = arith.addf %104, %111 : vector<32x128xf32>
      %113 = vector.extract_strided_slice %103 {offsets = [1, 0], sizes = [1, 128], strides = [1, 1]} : vector<4x128xf32> to vector<1x128xf32>
      %114 = vector.broadcast %113 : vector<1x128xf32> to vector<32x128xf32>
      %115 = arith.mulf %3, %114 : vector<32x128xf32>
      %116 = arith.truncf %115 : vector<32x128xf32> to vector<32x128xbf16>
      %c0_55 = arith.constant 0 : index
      %c1_56 = arith.constant 1 : index
      %c0_57 = arith.constant 0 : index
      %c0_58 = arith.constant 0 : index
      %117 = vector.load %arg7[%c0_55, %c1_56, %c0_57, %c0_58] : memref<1x4x32x32xbf16, #tpu.memory_space<vmem>>, vector<1x1x32x32xbf16>
      %118 = vector.shape_cast %117 : vector<1x1x32x32xbf16> to vector<32x32xbf16>
      %cst_59 = arith.constant dense<0.000000e+00> : vector<32x128xf32>
      %119 = tpu.matmul %118, %116, %cst_59 {dimension_numbers = #tpu.dot_dimension_numbers<[1], [0], [0], [1], [0, 0, 1, 1], [], []>} : vector<32x32xbf16>, vector<32x128xbf16>, vector<32x128xf32> -> vector<32x128xf32>
      %120 = arith.addf %112, %119 : vector<32x128xf32>
      %121 = vector.extract_strided_slice %103 {offsets = [2, 0], sizes = [1, 128], strides = [1, 1]} : vector<4x128xf32> to vector<1x128xf32>
      %122 = vector.broadcast %121 : vector<1x128xf32> to vector<32x128xf32>
      %123 = arith.mulf %3, %122 : vector<32x128xf32>
      %124 = arith.truncf %123 : vector<32x128xf32> to vector<32x128xbf16>
      %c0_60 = arith.constant 0 : index
      %c2_61 = arith.constant 2 : index
      %c0_62 = arith.constant 0 : index
      %c0_63 = arith.constant 0 : index
      %125 = vector.load %arg7[%c0_60, %c2_61, %c0_62, %c0_63] : memref<1x4x32x32xbf16, #tpu.memory_space<vmem>>, vector<1x1x32x32xbf16>
      %126 = vector.shape_cast %125 : vector<1x1x32x32xbf16> to vector<32x32xbf16>
      %cst_64 = arith.constant dense<0.000000e+00> : vector<32x128xf32>
      %127 = tpu.matmul %126, %124, %cst_64 {dimension_numbers = #tpu.dot_dimension_numbers<[1], [0], [0], [1], [0, 0, 1, 1], [], []>} : vector<32x32xbf16>, vector<32x128xbf16>, vector<32x128xf32> -> vector<32x128xf32>
      %128 = arith.addf %120, %127 : vector<32x128xf32>
      %129 = vector.extract_strided_slice %103 {offsets = [3, 0], sizes = [1, 128], strides = [1, 1]} : vector<4x128xf32> to vector<1x128xf32>
      %130 = vector.broadcast %129 : vector<1x128xf32> to vector<32x128xf32>
      %131 = arith.mulf %3, %130 : vector<32x128xf32>
      %132 = arith.truncf %131 : vector<32x128xf32> to vector<32x128xbf16>
      %c0_65 = arith.constant 0 : index
      %c3_66 = arith.constant 3 : index
      %c0_67 = arith.constant 0 : index
      %c0_68 = arith.constant 0 : index
      %133 = vector.load %arg7[%c0_65, %c3_66, %c0_67, %c0_68] : memref<1x4x32x32xbf16, #tpu.memory_space<vmem>>, vector<1x1x32x32xbf16>
      %134 = vector.shape_cast %133 : vector<1x1x32x32xbf16> to vector<32x32xbf16>
      %cst_69 = arith.constant dense<0.000000e+00> : vector<32x128xf32>
      %135 = tpu.matmul %134, %132, %cst_69 {dimension_numbers = #tpu.dot_dimension_numbers<[1], [0], [0], [1], [0, 0, 1, 1], [], []>} : vector<32x32xbf16>, vector<32x128xbf16>, vector<32x128xf32> -> vector<32x128xf32>
      %136 = arith.addf %128, %135 : vector<32x128xf32>
      %137 = arith.addf %3, %136 : vector<32x128xf32>
      %cst_70 = arith.constant 0.000000e+00 : f32
      %138 = vector.broadcast %cst_70 : f32 to vector<32x128xf32>
      %139 = arith.maximumf %137, %138 : vector<32x128xf32>
      %140 = arith.addf %139, %136 : vector<32x128xf32>
      %cst_71 = arith.constant 0.000000e+00 : f32
      %141 = vector.broadcast %cst_71 : f32 to vector<32x128xf32>
      %142 = arith.maximumf %140, %141 : vector<32x128xf32>
      %143 = arith.addf %142, %136 : vector<32x128xf32>
      %cst_72 = arith.constant 0.000000e+00 : f32
      %144 = vector.broadcast %cst_72 : f32 to vector<32x128xf32>
      %145 = arith.maximumf %143, %144 : vector<32x128xf32>
      %c0_73 = arith.constant 0 : index
      %c0_74 = arith.constant 0 : index
      %146 = vector.load %arg14[%c0_73, %c0_74] : memref<32x128xf32, #tpu.memory_space<vmem>>, vector<32x128xf32>
      tpu.vector_store %arg14[%c0_73, %c0_74], %145 {strides = array<i32>} : memref<32x128xf32, #tpu.memory_space<vmem>>, vector<32x128xf32>,
    } else {
    }
    %c0_6 = arith.constant 0 : index
    %c0_7 = arith.constant 0 : index
    %10 = vector.load %arg14[%c0_6, %c0_7] : memref<32x128xf32, #tpu.memory_space<vmem>>, vector<32x128xf32>
    %11 = arith.truncf %10 : vector<32x128xf32> to vector<32x128xbf16>
    %c0_8 = arith.constant 0 : index
    %c0_9 = arith.constant 0 : index
    %12 = vector.load %arg18[%c0_8, %c0_9] : memref<32x256xbf16, #tpu.memory_space<vmem>>, vector<32x128xbf16>
    tpu.vector_store %arg18[%c0_8, %c0_9], %11 {strides = array<i32>} : memref<32x256xbf16, #tpu.memory_space<vmem>>, vector<32x128xbf16>,
    %13 = arith.truncf %3 : vector<32x128xf32> to vector<32x128xbf16>
    %c0_10 = arith.constant 0 : index
    %c128 = arith.constant 128 : index
    %14 = vector.load %arg18[%c0_10, %c128] : memref<32x256xbf16, #tpu.memory_space<vmem>>, vector<32x128xbf16>
    tpu.vector_store %arg18[%c0_10, %c128], %13 {strides = array<i32>} : memref<32x256xbf16, #tpu.memory_space<vmem>>, vector<32x128xbf16>,
    %c0_11 = arith.constant 0 : index
    %c0_12 = arith.constant 0 : index
    %15 = vector.load %arg18[%c0_11, %c0_12] : memref<32x256xbf16, #tpu.memory_space<vmem>>, vector<32x256xbf16>
    %c0_13 = arith.constant 0 : index
    %c0_14 = arith.constant 0 : index
    %16 = vector.load %arg12[%c0_13, %c0_14] : memref<256x512xbf16, #tpu.memory_space<vmem>>, vector<256x512xbf16>
    %cst = arith.constant dense<0.000000e+00> : vector<32x512xf32>
    %17 = tpu.matmul %15, %16, %cst {dimension_numbers = #tpu.dot_dimension_numbers<[1], [0], [0], [1], [0, 0, 1, 1], [], []>} : vector<32x256xbf16>, vector<256x512xbf16>, vector<32x512xf32> -> vector<32x512xf32>
    %c0_15 = arith.constant 0 : index
    %c0_16 = arith.constant 0 : index
    %18 = vector.load %arg13[%c0_15, %c0_16] : memref<1x512xf32, #tpu.memory_space<vmem>>, vector<1x512xf32>
    %19 = vector.broadcast %18 : vector<1x512xf32> to vector<32x512xf32>
    %20 = arith.addf %17, %19 : vector<32x512xf32>
    %21 = vector.extract_strided_slice %20 {offsets = [0, 0], sizes = [32, 128], strides = [1, 1]} : vector<32x512xf32> to vector<32x128xf32>
    %22 = arith.negf %21 : vector<32x128xf32>
    %23 = math.exp %22 : vector<32x128xf32>
    %cst_17 = arith.constant 1.000000e+00 : f32
    %24 = vector.broadcast %cst_17 : f32 to vector<32x128xf32>
    %25 = arith.addf %24, %23 : vector<32x128xf32>
    %26 = arith.divf %24, %25 : vector<32x128xf32>
    %27 = vector.extract_strided_slice %20 {offsets = [0, 128], sizes = [32, 128], strides = [1, 1]} : vector<32x512xf32> to vector<32x128xf32>
    %28 = arith.negf %27 : vector<32x128xf32>
    %29 = math.exp %28 : vector<32x128xf32>
    %cst_18 = arith.constant 1.000000e+00 : f32
    %30 = vector.broadcast %cst_18 : f32 to vector<32x128xf32>
    %31 = arith.addf %30, %29 : vector<32x128xf32>
    %32 = arith.divf %30, %31 : vector<32x128xf32>
    %33 = vector.extract_strided_slice %20 {offsets = [0, 256], sizes = [32, 128], strides = [1, 1]} : vector<32x512xf32> to vector<32x128xf32>
    %34 = math.tanh %33 : vector<32x128xf32>
    %35 = vector.extract_strided_slice %20 {offsets = [0, 384], sizes = [32, 128], strides = [1, 1]} : vector<32x512xf32> to vector<32x128xf32>
    %36 = arith.negf %35 : vector<32x128xf32>
    %37 = math.exp %36 : vector<32x128xf32>
    %cst_19 = arith.constant 1.000000e+00 : f32
    %38 = vector.broadcast %cst_19 : f32 to vector<32x128xf32>
    %39 = arith.addf %38, %37 : vector<32x128xf32>
    %40 = arith.divf %38, %39 : vector<32x128xf32>
    %41 = arith.mulf %32, %4 : vector<32x128xf32>
    %42 = arith.mulf %26, %34 : vector<32x128xf32>
    %43 = arith.addf %41, %42 : vector<32x128xf32>
    %44 = math.tanh %43 : vector<32x128xf32>
    %45 = arith.mulf %40, %44 : vector<32x128xf32>
    %c0_20 = arith.constant 0 : index
    %c0_21 = arith.constant 0 : index
    %c0_22 = arith.constant 0 : index
    %46 = vector.load %arg8[%c0_20, %c0_21, %c0_22] : memref<1x32x1xf32, #tpu.memory_space<vmem>>, vector<1x32x1xf32>
    %47 = vector.shape_cast %46 : vector<1x32x1xf32> to vector<32x1xf32>
    %cst_23 = arith.constant 0.000000e+00 : f32
    %48 = vector.broadcast %cst_23 : f32 to vector<32x1xf32>
    %49 = arith.cmpf ogt, %47, %48 : vector<32x1xf32>
    %50 = vector.shape_cast %49 : vector<32x1xi1> to vector<32x1xi1>
    %51 = vector.broadcast %50 : vector<32x1xi1> to vector<32x128xi1>
    %52 = arith.select %51, %45, %10 : vector<32x128xi1>, vector<32x128xf32>
    %cst_24 = arith.constant 0.000000e+00 : f32
    %53 = vector.broadcast %cst_24 : f32 to vector<32x1xf32>
    %54 = arith.cmpf ogt, %47, %53 : vector<32x1xf32>
    %55 = vector.shape_cast %54 : vector<32x1xi1> to vector<32x1xi1>
    %56 = vector.broadcast %55 : vector<32x1xi1> to vector<32x128xi1>
    %57 = arith.select %56, %43, %4 : vector<32x128xi1>, vector<32x128xf32>
    %c0_25 = arith.constant 0 : index
    %c0_26 = arith.constant 0 : index
    %58 = vector.load %arg14[%c0_25, %c0_26] : memref<32x128xf32, #tpu.memory_space<vmem>>, vector<32x128xf32>
    tpu.vector_store %arg14[%c0_25, %c0_26], %52 {strides = array<i32>} : memref<32x128xf32, #tpu.memory_space<vmem>>, vector<32x128xf32>,
    %c0_27 = arith.constant 0 : index
    %c0_28 = arith.constant 0 : index
    %59 = vector.load %arg15[%c0_27, %c0_28] : memref<32x128xf32, #tpu.memory_space<vmem>>, vector<32x128xf32>
    tpu.vector_store %arg15[%c0_27, %c0_28], %57 {strides = array<i32>} : memref<32x128xf32, #tpu.memory_space<vmem>>, vector<32x128xf32>,
    %60 = arith.index_cast %arg0 : i32 to index
    %c0_29 = arith.constant 0 : index
    %61 = memref.load %arg3[%60, %c0_29] : memref<4x8xi32, #tpu.memory_space<smem>>
    %c0_i32_30 = arith.constant 0 : i32
    %62 = arith.cmpi sge, %61, %c0_i32_30 : i32
    %63 = arith.extui %62 : i1 to i32
    %c0_i32_31 = arith.constant 0 : i32
    %64 = arith.cmpi ne, %63, %c0_i32_31 : i32
    scf.if %64 {
      %103 = arith.index_cast %61 : i32 to index
      %c0_47 = arith.constant 0 : index
      %104 = vector.load %arg14[%103, %c0_47] : memref<32x128xf32, #tpu.memory_space<vmem>>, vector<1x128xf32>
      %c0_48 = arith.constant 0 : index
      %c0_49 = arith.constant 0 : index
      %105 = vector.load %arg17[%c0_48, %c0_49] : memref<8x128xf32, #tpu.memory_space<vmem>>, vector<1x128xf32>
      tpu.vector_store %arg17[%c0_48, %c0_49], %104 {strides = array<i32>} : memref<8x128xf32, #tpu.memory_space<vmem>>, vector<1x128xf32>,
    } else {
    }
    %65 = arith.index_cast %arg0 : i32 to index
    %c1 = arith.constant 1 : index
    %66 = memref.load %arg3[%65, %c1] : memref<4x8xi32, #tpu.memory_space<smem>>
    %c0_i32_32 = arith.constant 0 : i32
    %67 = arith.cmpi sge, %66, %c0_i32_32 : i32
    %68 = arith.extui %67 : i1 to i32
    %c0_i32_33 = arith.constant 0 : i32
    %69 = arith.cmpi ne, %68, %c0_i32_33 : i32
    scf.if %69 {
      %103 = arith.index_cast %66 : i32 to index
      %c0_47 = arith.constant 0 : index
      %104 = vector.load %arg14[%103, %c0_47] : memref<32x128xf32, #tpu.memory_space<vmem>>, vector<1x128xf32>
      %c1_48 = arith.constant 1 : index
      %c0_49 = arith.constant 0 : index
      %105 = vector.load %arg17[%c1_48, %c0_49] : memref<8x128xf32, #tpu.memory_space<vmem>>, vector<1x128xf32>
      tpu.vector_store %arg17[%c1_48, %c0_49], %104 {strides = array<i32>} : memref<8x128xf32, #tpu.memory_space<vmem>>, vector<1x128xf32>,
    } else {
    }
    %70 = arith.index_cast %arg0 : i32 to index
    %c2 = arith.constant 2 : index
    %71 = memref.load %arg3[%70, %c2] : memref<4x8xi32, #tpu.memory_space<smem>>
    %c0_i32_34 = arith.constant 0 : i32
    %72 = arith.cmpi sge, %71, %c0_i32_34 : i32
    %73 = arith.extui %72 : i1 to i32
    %c0_i32_35 = arith.constant 0 : i32
    %74 = arith.cmpi ne, %73, %c0_i32_35 : i32
    scf.if %74 {
      %103 = arith.index_cast %71 : i32 to index
      %c0_47 = arith.constant 0 : index
      %104 = vector.load %arg14[%103, %c0_47] : memref<32x128xf32, #tpu.memory_space<vmem>>, vector<1x128xf32>
      %c2_48 = arith.constant 2 : index
      %c0_49 = arith.constant 0 : index
      %105 = vector.load %arg17[%c2_48, %c0_49] : memref<8x128xf32, #tpu.memory_space<vmem>>, vector<1x128xf32>
      tpu.vector_store %arg17[%c2_48, %c0_49], %104 {strides = array<i32>} : memref<8x128xf32, #tpu.memory_space<vmem>>, vector<1x128xf32>,
    } else {
    }
    %75 = arith.index_cast %arg0 : i32 to index
    %c3 = arith.constant 3 : index
    %76 = memref.load %arg3[%75, %c3] : memref<4x8xi32, #tpu.memory_space<smem>>
    %c0_i32_36 = arith.constant 0 : i32
    %77 = arith.cmpi sge, %76, %c0_i32_36 : i32
    %78 = arith.extui %77 : i1 to i32
    %c0_i32_37 = arith.constant 0 : i32
    %79 = arith.cmpi ne, %78, %c0_i32_37 : i32
    scf.if %79 {
      %103 = arith.index_cast %76 : i32 to index
      %c0_47 = arith.constant 0 : index
      %104 = vector.load %arg14[%103, %c0_47] : memref<32x128xf32, #tpu.memory_space<vmem>>, vector<1x128xf32>
      %c3_48 = arith.constant 3 : index
      %c0_49 = arith.constant 0 : index
      %105 = vector.load %arg17[%c3_48, %c0_49] : memref<8x128xf32, #tpu.memory_space<vmem>>, vector<1x128xf32>
      tpu.vector_store %arg17[%c3_48, %c0_49], %104 {strides = array<i32>} : memref<8x128xf32, #tpu.memory_space<vmem>>, vector<1x128xf32>,
    } else {
    }
    %80 = arith.index_cast %arg0 : i32 to index
    %c4 = arith.constant 4 : index
    %81 = memref.load %arg3[%80, %c4] : memref<4x8xi32, #tpu.memory_space<smem>>
    %c0_i32_38 = arith.constant 0 : i32
    %82 = arith.cmpi sge, %81, %c0_i32_38 : i32
    %83 = arith.extui %82 : i1 to i32
    %c0_i32_39 = arith.constant 0 : i32
    %84 = arith.cmpi ne, %83, %c0_i32_39 : i32
    scf.if %84 {
      %103 = arith.index_cast %81 : i32 to index
      %c0_47 = arith.constant 0 : index
      %104 = vector.load %arg14[%103, %c0_47] : memref<32x128xf32, #tpu.memory_space<vmem>>, vector<1x128xf32>
      %c4_48 = arith.constant 4 : index
      %c0_49 = arith.constant 0 : index
      %105 = vector.load %arg17[%c4_48, %c0_49] : memref<8x128xf32, #tpu.memory_space<vmem>>, vector<1x128xf32>
      tpu.vector_store %arg17[%c4_48, %c0_49], %104 {strides = array<i32>} : memref<8x128xf32, #tpu.memory_space<vmem>>, vector<1x128xf32>,
    } else {
    }
    %85 = arith.index_cast %arg0 : i32 to index
    %c5 = arith.constant 5 : index
    %86 = memref.load %arg3[%85, %c5] : memref<4x8xi32, #tpu.memory_space<smem>>
    %c0_i32_40 = arith.constant 0 : i32
    %87 = arith.cmpi sge, %86, %c0_i32_40 : i32
    %88 = arith.extui %87 : i1 to i32
    %c0_i32_41 = arith.constant 0 : i32
    %89 = arith.cmpi ne, %88, %c0_i32_41 : i32
    scf.if %89 {
      %103 = arith.index_cast %86 : i32 to index
      %c0_47 = arith.constant 0 : index
      %104 = vector.load %arg14[%103, %c0_47] : memref<32x128xf32, #tpu.memory_space<vmem>>, vector<1x128xf32>
      %c5_48 = arith.constant 5 : index
      %c0_49 = arith.constant 0 : index
      %105 = vector.load %arg17[%c5_48, %c0_49] : memref<8x128xf32, #tpu.memory_space<vmem>>, vector<1x128xf32>
      tpu.vector_store %arg17[%c5_48, %c0_49], %104 {strides = array<i32>} : memref<8x128xf32, #tpu.memory_space<vmem>>, vector<1x128xf32>,
    } else {
    }
    %90 = arith.index_cast %arg0 : i32 to index
    %c6 = arith.constant 6 : index
    %91 = memref.load %arg3[%90, %c6] : memref<4x8xi32, #tpu.memory_space<smem>>
    %c0_i32_42 = arith.constant 0 : i32
    %92 = arith.cmpi sge, %91, %c0_i32_42 : i32
    %93 = arith.extui %92 : i1 to i32
    %c0_i32_43 = arith.constant 0 : i32
    %94 = arith.cmpi ne, %93, %c0_i32_43 : i32
    scf.if %94 {
      %103 = arith.index_cast %91 : i32 to index
      %c0_47 = arith.constant 0 : index
      %104 = vector.load %arg14[%103, %c0_47] : memref<32x128xf32, #tpu.memory_space<vmem>>, vector<1x128xf32>
      %c6_48 = arith.constant 6 : index
      %c0_49 = arith.constant 0 : index
      %105 = vector.load %arg17[%c6_48, %c0_49] : memref<8x128xf32, #tpu.memory_space<vmem>>, vector<1x128xf32>
      tpu.vector_store %arg17[%c6_48, %c0_49], %104 {strides = array<i32>} : memref<8x128xf32, #tpu.memory_space<vmem>>, vector<1x128xf32>,
    } else {
    }
    %95 = arith.index_cast %arg0 : i32 to index
    %c7 = arith.constant 7 : index
    %96 = memref.load %arg3[%95, %c7] : memref<4x8xi32, #tpu.memory_space<smem>>
    %c0_i32_44 = arith.constant 0 : i32
    %97 = arith.cmpi sge, %96, %c0_i32_44 : i32
    %98 = arith.extui %97 : i1 to i32
    %c0_i32_45 = arith.constant 0 : i32
    %99 = arith.cmpi ne, %98, %c0_i32_45 : i32
    scf.if %99 {
      %103 = arith.index_cast %96 : i32 to index
      %c0_47 = arith.constant 0 : index
      %104 = vector.load %arg14[%103, %c0_47] : memref<32x128xf32, #tpu.memory_space<vmem>>, vector<1x128xf32>
      %c7_48 = arith.constant 7 : index
      %c0_49 = arith.constant 0 : index
      %105 = vector.load %arg17[%c7_48, %c0_49] : memref<8x128xf32, #tpu.memory_space<vmem>>, vector<1x128xf32>
      tpu.vector_store %arg17[%c7_48, %c0_49], %104 {strides = array<i32>} : memref<8x128xf32, #tpu.memory_space<vmem>>, vector<1x128xf32>,
    } else {
    }
    %c3_i32 = arith.constant 3 : i32
    %100 = arith.cmpi eq, %arg0, %c3_i32 : i32
    %101 = arith.extui %100 : i1 to i32
    %c0_i32_46 = arith.constant 0 : i32
    %102 = arith.cmpi ne, %101, %c0_i32_46 : i32
    scf.if %102 {
      %c0_47 = arith.constant 0 : index
      %c0_48 = arith.constant 0 : index
      %103 = vector.load %arg14[%c0_47, %c0_48] : memref<32x128xf32, #tpu.memory_space<vmem>>, vector<32x128xf32>
      %104 = arith.truncf %103 : vector<32x128xf32> to vector<32x128xbf16>
      %c0_49 = arith.constant 0 : index
      %c0_50 = arith.constant 0 : index
      %105 = vector.load %arg9[%c0_49, %c0_50] : memref<128x32xbf16, #tpu.memory_space<vmem>>, vector<128x32xbf16>
      %cst_51 = arith.constant dense<0.000000e+00> : vector<128x128xf32>
      %106 = tpu.matmul %105, %104, %cst_51 {dimension_numbers = #tpu.dot_dimension_numbers<[1], [0], [0], [1], [0, 0, 1, 1], [], []>} : vector<128x32xbf16>, vector<32x128xbf16>, vector<128x128xf32> -> vector<128x128xf32>
      %107 = vector.shape_cast %106 : vector<128x128xf32> to vector<8x16x128xf32>
      %c0_52 = arith.constant 0 : index
      %c0_53 = arith.constant 0 : index
      %108 = vector.load %arg17[%c0_52, %c0_53] : memref<8x128xf32, #tpu.memory_space<vmem>>, vector<8x128xf32>
      %109 = vector.shape_cast %108 : vector<8x128xf32> to vector<8x1x128xf32>
      %110 = vector.broadcast %109 : vector<8x1x128xf32> to vector<8x16x128xf32>
      %111 = arith.mulf %110, %107 : vector<8x16x128xf32>
      %cst_54 = arith.constant dense<0.000000e+00> : vector<8x16xf32>
      %112 = vector.multi_reduction <add>, %111, %cst_54 [2] : vector<8x16x128xf32> to vector<8x16xf32>
      %c0_55 = arith.constant 0 : index
      %c0_56 = arith.constant 0 : index
      %113 = vector.load %arg10[%c0_55, %c0_56] : memref<8x16xf32, #tpu.memory_space<vmem>>, vector<8x16xf32>
      %cst_57 = arith.constant 0.000000e+00 : f32
      %114 = vector.broadcast %cst_57 : f32 to vector<8x16xf32>
      %115 = arith.cmpf ogt, %113, %114 : vector<8x16xf32>
      %cst_58 = arith.constant -1.000000e+30 : f32
      %116 = vector.broadcast %cst_58 : f32 to vector<8x16xf32>
      %117 = arith.select %115, %112, %116 : vector<8x16xi1>, vector<8x16xf32>
      %cst_59 = arith.constant dense<0xFF800000> : vector<8xf32>
      %118 = vector.multi_reduction <maximumf>, %117, %cst_59 [1] : vector<8x16xf32> to vector<8xf32>
      %119 = vector.shape_cast %118 : vector<8xf32> to vector<8x1xf32>
      %120 = vector.broadcast %119 : vector<8x1xf32> to vector<8x16xf32>
      %121 = arith.subf %117, %120 : vector<8x16xf32>
      %122 = math.exp %121 : vector<8x16xf32>
      %cst_60 = arith.constant dense<0.000000e+00> : vector<8xf32>
      %123 = vector.multi_reduction <add>, %122, %cst_60 [1] : vector<8x16xf32> to vector<8xf32>
      %124 = vector.shape_cast %123 : vector<8xf32> to vector<8x1xf32>
      %125 = math.log %124 : vector<8x1xf32>
      %126 = arith.addf %119, %125 : vector<8x1xf32>
      %127 = vector.extract_strided_slice %112 {offsets = [0, 0], sizes = [8, 1], strides = [1, 1]} : vector<8x16xf32> to vector<8x1xf32>
      %128 = arith.subf %126, %127 : vector<8x1xf32>
      %c0_61 = arith.constant 0 : index
      %c0_62 = arith.constant 0 : index
      %129 = vector.load %arg11[%c0_61, %c0_62] : memref<8x1xf32, #tpu.memory_space<vmem>>, vector<8x1xf32>
      %130 = arith.mulf %128, %129 : vector<8x1xf32>
      %cst_63 = arith.constant dense<0.000000e+00> : vector<1xf32>
      %131 = vector.multi_reduction <add>, %130, %cst_63 [0] : vector<8x1xf32> to vector<1xf32>
      %132 = vector.shape_cast %131 : vector<1xf32> to vector<1x1xf32>
      %c0_64 = arith.constant 0 : index
      %c0_65 = arith.constant 0 : index
      %133 = vector.load %arg16[%c0_64, %c0_65] : memref<1x1xf32, #tpu.memory_space<vmem>>, vector<1x1xf32>
      tpu.vector_store %arg16[%c0_64, %c0_65], %132 {strides = array<i32>} : memref<1x1xf32, #tpu.memory_space<vmem>>, vector<1x1xf32>,
    } else {
    }
    return
  }
  func.func @transform_0(%arg0: i32, %arg1: memref<4xi32, #tpu.memory_space<smem>>, %arg2: memref<4xi32, #tpu.memory_space<smem>>, %arg3: memref<4x8xi32, #tpu.memory_space<smem>>) -> (i32, i32) {
    %c0_i32 = arith.constant 0 : i32
    %c0_i32_0 = arith.constant 0 : i32
    %c0_i32_1 = arith.constant 0 : i32
    return %c0_i32, %c0_i32_0 : i32, i32
  }
  func.func @transform_1(%arg0: i32, %arg1: memref<4xi32, #tpu.memory_space<smem>>, %arg2: memref<4xi32, #tpu.memory_space<smem>>, %arg3: memref<4x8xi32, #tpu.memory_space<smem>>) -> (i32, i32) {
    %c0_i32 = arith.constant 0 : i32
    %c0_i32_0 = arith.constant 0 : i32
    %c0_i32_1 = arith.constant 0 : i32
    return %c0_i32, %c0_i32_0 : i32, i32
  }
  func.func @transform_2(%arg0: i32, %arg1: memref<4xi32, #tpu.memory_space<smem>>, %arg2: memref<4xi32, #tpu.memory_space<smem>>, %arg3: memref<4x8xi32, #tpu.memory_space<smem>>) -> (i32, i32) {
    %c0_i32 = arith.constant 0 : i32
    %c0_i32_0 = arith.constant 0 : i32
    %c0_i32_1 = arith.constant 0 : i32
    return %c0_i32, %c0_i32_0 : i32, i32
  }
  func.func @transform_3(%arg0: i32, %arg1: memref<4xi32, #tpu.memory_space<smem>>, %arg2: memref<4xi32, #tpu.memory_space<smem>>, %arg3: memref<4x8xi32, #tpu.memory_space<smem>>) -> (i32, i32, i32, i32) {
    %0 = arith.index_cast %arg0 : i32 to index
    %1 = memref.load %arg1[%0] : memref<4xi32, #tpu.memory_space<smem>>
    %c0_i32 = arith.constant 0 : i32
    %c0_i32_0 = arith.constant 0 : i32
    %c0_i32_1 = arith.constant 0 : i32
    %c0_i32_2 = arith.constant 0 : i32
    return %1, %c0_i32, %c0_i32_0, %c0_i32_1 : i32, i32, i32, i32
  }
  func.func @transform_4(%arg0: i32, %arg1: memref<4xi32, #tpu.memory_space<smem>>, %arg2: memref<4xi32, #tpu.memory_space<smem>>, %arg3: memref<4x8xi32, #tpu.memory_space<smem>>) -> (i32, i32, i32) {
    %c0_i32 = arith.constant 0 : i32
    %c0_i32_0 = arith.constant 0 : i32
    %c0_i32_1 = arith.constant 0 : i32
    return %arg0, %c0_i32, %c0_i32_0 : i32, i32, i32
  }
  func.func @transform_5(%arg0: i32, %arg1: memref<4xi32, #tpu.memory_space<smem>>, %arg2: memref<4xi32, #tpu.memory_space<smem>>, %arg3: memref<4x8xi32, #tpu.memory_space<smem>>) -> (i32, i32) {
    %c0_i32 = arith.constant 0 : i32
    %c0_i32_0 = arith.constant 0 : i32
    %c0_i32_1 = arith.constant 0 : i32
    return %c0_i32, %c0_i32_0 : i32, i32
  }
  func.func @transform_6(%arg0: i32, %arg1: memref<4xi32, #tpu.memory_space<smem>>, %arg2: memref<4xi32, #tpu.memory_space<smem>>, %arg3: memref<4x8xi32, #tpu.memory_space<smem>>) -> (i32, i32) {
    %c0_i32 = arith.constant 0 : i32
    %c0_i32_0 = arith.constant 0 : i32
    %c0_i32_1 = arith.constant 0 : i32
    return %c0_i32, %c0_i32_0 : i32, i32
  }
  func.func @transform_7(%arg0: i32, %arg1: memref<4xi32, #tpu.memory_space<smem>>, %arg2: memref<4xi32, #tpu.memory_space<smem>>, %arg3: memref<4x8xi32, #tpu.memory_space<smem>>) -> (i32, i32) {
    %c0_i32 = arith.constant 0 : i32
    %c0_i32_0 = arith.constant 0 : i32
    %c0_i32_1 = arith.constant 0 : i32
    return %c0_i32, %c0_i32_0 : i32, i32
  }
  func.func @transform_8(%arg0: i32, %arg1: memref<4xi32, #tpu.memory_space<smem>>, %arg2: memref<4xi32, #tpu.memory_space<smem>>, %arg3: memref<4x8xi32, #tpu.memory_space<smem>>) -> (i32, i32) {
    %c0_i32 = arith.constant 0 : i32
    %c0_i32_0 = arith.constant 0 : i32
    %c0_i32_1 = arith.constant 0 : i32
    return %c0_i32, %c0_i32_0 : i32, i32
  }
  func.func @transform_9(%arg0: i32, %arg1: memref<4xi32, #tpu.memory_space<smem>>, %arg2: memref<4xi32, #tpu.memory_space<smem>>, %arg3: memref<4x8xi32, #tpu.memory_space<smem>>) -> (i32, i32) {
    %c0_i32 = arith.constant 0 : i32
    %c0_i32_0 = arith.constant 0 : i32
    %c0_i32_1 = arith.constant 0 : i32
    return %c0_i32, %c0_i32_0 : i32, i32
  }
  func.func @transform_10(%arg0: i32, %arg1: memref<4xi32, #tpu.memory_space<smem>>, %arg2: memref<4xi32, #tpu.memory_space<smem>>, %arg3: memref<4x8xi32, #tpu.memory_space<smem>>) -> (i32, i32) {
    %c0_i32 = arith.constant 0 : i32
    %c0_i32_0 = arith.constant 0 : i32
    %c0_i32_1 = arith.constant 0 : i32
    return %c0_i32, %c0_i32_0 : i32, i32
  }
  func.func @transform_11(%arg0: i32, %arg1: memref<4xi32, #tpu.memory_space<smem>>, %arg2: memref<4xi32, #tpu.memory_space<smem>>, %arg3: memref<4x8xi32, #tpu.memory_space<smem>>) -> (i32, i32) {
    %c0_i32 = arith.constant 0 : i32
    %c0_i32_0 = arith.constant 0 : i32
    %c0_i32_1 = arith.constant 0 : i32
    return %c0_i32, %c0_i32_0 : i32, i32
  }
  func.func @transform_12(%arg0: i32, %arg1: memref<4xi32, #tpu.memory_space<smem>>, %arg2: memref<4xi32, #tpu.memory_space<smem>>, %arg3: memref<4x8xi32, #tpu.memory_space<smem>>) -> (i32, i32) {
    %c0_i32 = arith.constant 0 : i32
    %c0_i32_0 = arith.constant 0 : i32
    %c0_i32_1 = arith.constant 0 : i32
    return %c0_i32, %c0_i32_0 : i32, i32
  }
}

</mosaic_0001>

<bundles_post_ra>
// kernel: tpu_custom_call.1
= control target key start
LH: loop header
LB: loop body
LE: loop exit
PB: predicated region body
PF: predicated region fallthrough
CT: control target
= control target key end

     0   :  { %s3042_s24 = smov [#allocation5]   ;;  %s3043_s25 = smov [#allocation6]   ;;  %s3799_s0 = inlined_call_operand.vmem [shape: s32[4], index: 0, kind: input, shape index: {}]   ;;  %s3800_s3 = inlined_call_operand.vmem [shape: f32[32,128], index: 3, kind: input, shape index: {}]   ;;  %s3801_s4 = inlined_call_operand.vmem [shape: f32[32,128], index: 4, kind: input, shape index: {}]   ;;  %s3802_s5 = inlined_call_operand.vmem [shape: f32[4,128], index: 5, kind: input, shape index: {}]   ;;  %s3803_s6 = inlined_call_operand.hbm [shape: bf16[4,4,32,32], index: 6, kind: input, shape index: {}]   ;;  %s3804_s7 = inlined_call_operand.vmem [shape: f32[4,32,1], index: 7, kind: input, shape index: {}]   ;;  %s3805_s8 = inlined_call_operand.vmem [shape: bf16[128,32], index: 8, kind: input, shape index: {}]   ;;  %s3806_s9 = inlined_call_operand.vmem [shape: f32[8,16], index: 9, kind: input, shape index: {}]   ;;  %s3807_s10 = inlined_call_operand.vmem [shape: f32[8,1], index: 10, kind: input, shape index: {}]   ;;  %s3808_s11 = inlined_call_operand.hbm [shape: bf16[256,512], index: 11, kind: input, shape index: {}]   ;;  %s3809_s12 = inlined_call_operand.vmem [shape: f32[1,512], index: 12, kind: input, shape index: {}]   ;;  %s3810_s13 = inlined_call_operand.hbm [shape: f32[32,128], index: 13, kind: output, shape index: {0}]   ;;  %s3811_s14 = inlined_call_operand.hbm [shape: f32[32,128], index: 14, kind: output, shape index: {1}]   ;;  %s3812_s15 = inlined_call_operand.hbm [shape: f32[1,1], index: 15, kind: output, shape index: {2}]   ;;  %s3813_s1 = inlined_call_operand.vmem [shape: s32[4], index: 1, kind: input, shape index: {}]   ;;  %s3814_s2 = inlined_call_operand.vmem [shape: s32[4,8], index: 2, kind: input, shape index: {}]  }
   0x1   :  { %3817 = sst [smem:[#allocation25_spill]] %s3808_s11  ;;  %s22_s20 = sshll.u32 %s3799_s0, 4  ;;  %s23_s20 = int_to_ptr.vmem [resolvable:$true] %s22_s20 }
   0x2   :  { %3818 = sst [smem:[#allocation26_spill]] %s3810_s13  ;;  %s27_s23 = sshll.u32 %s3813_s1, 4  ;;  %s28_s23 = int_to_ptr.vmem [resolvable:$true] %s27_s23 }
   0x3   :  { %3819 = sst [smem:[#allocation27_spill]] %s3811_s14  ;;  %s32_s28 = sshll.u32 %s3814_s2, 4  ;;  %s33_s28 = int_to_ptr.vmem [resolvable:$true] %s32_s28 }
   0x4   :  { %3820 = sst [smem:[#allocation28_spill]] %s3812_s15  ;;  %s3044_s29 = smov [#allocation7]  }
   0x5   :  { %25 = dma.vmem_to_smem %s23_s20, 16, %s3042_s24, [#allocation4] }
   0x6   :  { %30 = dma.vmem_to_smem %s28_s23, 16, %s3043_s25, [#allocation4] }
   0x7   :  { %35 = dma.vmem_to_smem %s33_s28, 64, %s3044_s29, [#allocation4] }
   0x8   :  { %3008 = dma.done.wait [#allocation4], 96 }
   0x9   :  { %3009 = vsyncadd [#allocation4], 4294967200 }
   0xa   :  { %38 = sfence }
   0xb   :  { %39 = vsyncpa [#allocation9], 0 }
   0xc   :  { %41 = vsyncpa [#allocation9 + $0x1], 0 }
   0xd   :  { %42 = vsyncpa [#allocation12], 0 }
   0xe   :  { %43 = vsyncpa [#allocation10], 0 }
   0xf   :  { %44 = vsyncpa [#allocation15], 0  ;;  %s3146_s0 = smov 0   ;;  %s3148_s1 = smov 0  }
  0x10   :  { %s3150_s30 = smov 0   ;;  %s3152_s16 = smov 0  }
  0x11 LB: > { %s3165_s2 = sadd.s32 4294967295, %s3040_s16   ;;  %p135_p0 = scmp.ne.s32.totalorder %s3032_s1, %s3028_s0  ;;  %s3040_s16 = sphi %s3152_s16, %s3859_s16   ;;  %s3036_s30 = sphi %s3150_s30, %s3862_s30   ;;  %s3032_s1 = sphi %s3148_s1, %s3861_s1   ;;  %s3028_s0 = sphi %s3146_s0, %s3860_s0  }
  0x12   : > { %p136_p1 = scmp.eq.s32.totalorder %s3165_s2, 0  ;;  %p2155_p2 = scmp.ge.s32.totalorder %s3040_s16, 1 }
  0x13   : > { %p340_p3 = scmp.lt.s32.totalorder %s3040_s16, 5  ;;  %p2156_p4 = scmp.ne.s32.totalorder %s3165_s2, 0 }
  0x14   : > { %p3174_p5 = por %p136_p1, %p135_p0  ;;  %s3822_s11 = sld [smem:[#allocation25_spill]] }
  0x15   : > { %p3181_p6 = pnand %p2155_p2, %p340_p3  ;;  %s3045_s22 = smov [#allocation11]  }
  0x16   : > { %s371_s23 = sshll.u32 %s3045_s22, 4  ;;  %s3190_s24 = sadd.s32 1, %s3040_s16   ;;  %s372_s23 = int_to_ptr.vmem [resolvable:$true] %s371_s23 }
  0x17   : > { %p2674_p7 = pneg %p3181_p6  ;;  %3824 = sst [smem:[#allocation24_spill]] %s3190_s24 }
  0x18   : > { %s3046_s25 = smov 256   ;;  %s3047_s26 = smov 16  }
  0x19   : > { %p2675_p8 = pnand %p2674_p7, %p136_p1  ;;  %s117_s27 = sld [smem:[#allocation5 + %s3040_s16]] }
  0x1a   : > { %s369_s20 = sshll.u32 %s3822_s11, 4  ;;  %s118_s28 = sld [smem:[#allocation5 + %s3190_s24]]  ;;  %s370_s20 = int_to_ptr.hbm [resolvable:$true] %s369_s20 }
  0x1b   : > { %2677 = dma.hbm_to_vmem [thread:$0]  (!%p2675_p8), %s370_s20, 8192, %s372_s23, [#allocation12], %s3046_s25, %s3046_s25, %s3047_s26  }
  0x1c   : > { %p129_p9 = scmp.ne.s32.totalorder %s3036_s30, %s3032_s1  ;;  %p130_p10 = scmp.eq.s32.totalorder %s3040_s16, 0 }
  0x1d   : > { %s388_s29 = sand.u32 1, %s3036_s30   ;;  %s122_s0 = sadd.s32 1, %s3036_s30 }
  0x1e   : > { %p131_p11 = por %p130_p10, %p129_p9  ;;  %p2685_p12 = scmp.lt.s32.totalorder %s3040_s16, 4 }
  0x1f   : > { %s2158_s19 = sshll.u32 %s388_s29, 6 }
  0x20   : > { %s119_s18 = ssub.s32 %s117_s27, %s118_s28  ;;  %p3200_p0 = pnand %p2685_p12, %p131_p11 }
  0x21   : > { %p120_p13 = scmp.eq.s32.totalorder %s119_s18, 0  ;;  %s3864_s16 = smov (!%p131_p11, %s3040_s16), 0 }
  0x22   : > { %s2656_s11 = scalar_select %p131_p11, [#allocation5], [#allocation17] }
  0x23   : > { %s3205_s15 = scalar_select %p120_p13, %s3036_s30, %s122_s0  }
  0x24   : > { %s3866_s11 = smov (!%p2685_p12, %s2656_s11), [#allocation18]  ;;  %s3868_s16 = smov (!%p2685_p12, %s3864_s16), 0 }
  0x25   : > { %s393_s20 = sld [smem:[%s3866_s11 + %s3868_s16]]  ;;  %s392_s23 = scalar_lea.vmem [#allocation8], %s2158_s19 }
  0x26   : > { %s401_s25 = sshll.u32 %s392_s23, 4  ;;  %s389_s18 = scalar_lea.sflag [#allocation9], %s388_s29  ;;  %s402_s25 = int_to_ptr.vmem [resolvable:$true] %s401_s25 }
  0x27   : > { %p2882_p3 = pneg %p3200_p0  ;;  %s2885_s19 = scalar_lea.hbm %s3803_s6, 256 }
  0x2b   : > { %s2562_s26 = sshll.u32 %s393_s20, 6 }
  0x2c   : > { %s398_s27 = scalar_lea.hbm %s3803_s6, %s2562_s26 }
  0x2d   : > { %s399_s28 = sshll.u32 %s398_s27, 4  ;;  %s400_s28 = int_to_ptr.hbm [resolvable:$true] %s399_s28 }
  0x2e   : > { %s2878_s14 = sshra.s32 %s400_s28, 4  ;;  %s2879_s14 = int_to_ptr.hbm [resolvable:$true] %s2878_s14 }
  0x2f   : > { %s2880_s0 = scalar_lea.hbm %s2879_s14, 64  ;;  %p2886_p9 = scmp.lt.s32.totalorder %s2879_s14, %s3803_s6 }
  0x30   : > { %p2881_p2 = scmp.ne.s32.totalorder %s2879_s14, %s2880_s0  ;;  %p2887_p10 = scmp.lt.s32.totalorder %s2885_s19, %s2880_s0 }
  0x32   : > { %p2883_p7 = pnand %p2882_p3, %p2881_p2  ;;  %p2888_p11 = por %p2887_p10, %p2886_p9 }
  0x34   : > { %p2884_p8 = pneg %p2883_p7 }
  0x36   : > { %p2889_p12 = pnand %p2888_p11, %p2884_p8 }
  0x38   : > { %2892 = shalt.err (!%p2889_p12)
}
  0x39   : > { %s3048_s13 = smov 64   ;;  %s3049_s24 = smov 4  }
  0x3a   : > { %2683 = dma.hbm_to_vmem [thread:$0]  (!%p3200_p0), %s400_s28, 1024, %s402_s25, %s389_s18, %s3048_s13, %s3048_s13, %s3049_s24  }
  0x3b   : > { %421 = sbr.rel (%p3181_p6) target bundleno = 1270 (0x4f6), region = 60  ;;  %s423_s29 = sand.u32 (!%p3181_p6), 1, %s3032_s1  }
  0x3c   : > { %s2162_s26 = sshll.u32 (!%p3181_p6), %s423_s29, 6  ;;  %s424_s27 = scalar_lea.sflag (!%p3181_p6), [#allocation9], %s423_s29 }
  0x3d   : > { %s3224_s11 = scalar_lea.vmem (!%p3181_p6), [#allocation8], %s2162_s26 }
  0x40   : > { %3011 = dma.done.wait (%p3174_p5), %s424_s27, 1024  }
  0x41   : > { %3013 = vsyncadd (%p3174_p5), %s424_s27, 4294966272 }
  0x42   : > { %3015 = dma.done.wait (%p136_p1), [#allocation12], 8192  }
  0x43   : > { %3017 = vsyncadd (%p136_p1), [#allocation12], 4294959104  ;;  %p475_p6 = scmp.lt.s32.totalorder %s3165_s2, 3 }
  0x44   : > { %484 = sbr.rel (%p2156_p4) target bundleno = 83 (0x53), region = 72 }
  0x45   : > { %s476_s14 = scalar_select %p475_p6, %s3165_s2, 3 }
  0x47   : > { %s2563_s21 = sshll.u32 %s476_s14, 5 }
  0x48   : > { %s3239_s28 = scalar_lea.vmem %s3804_s7, %s2563_s21 }
  0x49   : > { %v485_v0 = vld [vmem:[%s3800_s3] sm:$0xff]  ;;  %v486_v1 = vld [vmem:[%s3800_s3 + $0x8] sm:$0xff]  ;;  %v487_v2 = vld [vmem:[%s3800_s3 + $0x10] sm:$0xff]  ;;  %v3050_v8 = vmov 0.0  }
  0x4a   : > { %489 = vst [vmem:[#allocation13] sm:$0xff] %v485_v0  ;;  %v488_v3 = vld [vmem:[%s3800_s3 + $0x18] sm:$0xff]  ;;  %v493_v4 = vld [vmem:[%s3801_s4] sm:$0xff]  ;;  %v494_v5 = vld [vmem:[%s3801_s4 + $0x8] sm:$0xff] }
  0x4b   : > { %490 = vst [vmem:[#allocation13 + $0x8] sm:$0xff] %v486_v1  ;;  %v495_v6 = vld [vmem:[%s3801_s4 + $0x10] sm:$0xff]  ;;  %v496_v7 = vld [vmem:[%s3801_s4 + $0x18] sm:$0xff] }
  0x4c   : > { %491 = vst [vmem:[#allocation13 + $0x10] sm:$0xff] %v487_v2 }
  0x4d   : > { %492 = vst [vmem:[#allocation13 + $0x18] sm:$0xff] %v488_v3 }
  0x4e   : > { %497 = vst [vmem:[#allocation14] sm:$0xff] %v493_v4 }
  0x4f   : > { %498 = vst [vmem:[#allocation14 + $0x8] sm:$0xff] %v494_v5 }
  0x50   : > { %499 = vst [vmem:[#allocation14 + $0x10] sm:$0xff] %v495_v6 }
  0x51   : > { %500 = vst [vmem:[#allocation14 + $0x18] sm:$0xff] %v496_v7 }
  0x52   : > { %501 = vst [vmem:[#allocation2] sm:$0xff] %v3050_v8 }
  0x53 PF: > { %v3267_v9 = vld [vmem:[#allocation13] sm:$0xff]  ;;  %v3269_v10 = vld [vmem:[#allocation13 + $0x8] sm:$0xff]  ;;  %v3271_v11 = vld [vmem:[#allocation13 + $0x10] sm:$0xff]  ;;  %s510_s17 = sld [smem:[#allocation6 + %s3165_s2]] }
  0x54   : > { %v3274_v12 = vld [vmem:[#allocation13 + $0x18] sm:$0xff] }
  0x55   : > { %v3276_v13 = vld [vmem:[#allocation14] sm:$0xff] }
  0x56   : > { %v3278_v14 = vld [vmem:[#allocation14 + $0x8] sm:$0xff] }
  0x57   : > { %v3280_v15 = vld [vmem:[#allocation14 + $0x10] sm:$0xff] }
  0x58   : > { %v3282_v16 = vld [vmem:[#allocation14 + $0x18] sm:$0xff] }
  0x59   : > { %p2167_p1 = scmp.le.s32.totalorder %s510_s17, 0 }
  0x5b   : > { %514 = sbr.rel (%p2167_p1) target bundleno = 284 (0x11c), region = 76 }
  0x60   : > { %v515_v17 = vld [vmem:[%s3802_s5] sm:$0xf]  ;;  %v2566_v46 = vld [vmem:[%s3224_s11 + $0x10] sm:$0xff]  ;;  %v2564_v47 = vld [vmem:[%s3224_s11] sm:$0xff]  ;;  %vm549_vm0 = vcmask 261120  }
  0x61   : > { %v527_v18 = vperm.slane %v515_v17, 1  ;;  %v516_v19 = vperm.slane %v515_v17, 0  ;;  %v610_v20 = vperm.slane %v515_v17, 2  ;;  %v661_v21 = vperm.slane %v515_v17, 3  ;;  %v2568_v48 = vld [vmem:[%s3224_s11 + $0x20] sm:$0xff]  ;;  %v2570_v49 = vld [vmem:[%s3224_s11 + $0x30] sm:$0xff] }
  0x62   : > { %v2567_v50 = vld [vmem:[%s3224_s11 + $0x18] sm:$0xff]  ;;  %v2565_v51 = vld [vmem:[%s3224_s11 + $0x8] sm:$0xff] }
  0x63   : > { %v530_v22 = vmul.f32 %v527_v18, %v3271_v11  ;;  %v531_v23 = vmul.f32 %v527_v18, %v3274_v12  ;;  %v519_v24 = vmul.f32 %v516_v19, %v3271_v11  ;;  %v520_v25 = vmul.f32 %v516_v19, %v3274_v12  ;;  %v2569_v52 = vld [vmem:[%s3224_s11 + $0x28] sm:$0xff]  ;;  %v2571_v53 = vld [vmem:[%s3224_s11 + $0x38] sm:$0xff] }
  0x64   : > { %v613_v26 = vmul.f32 %v610_v20, %v3271_v11  ;;  %v614_v27 = vmul.f32 %v610_v20, %v3274_v12  ;;  %v664_v28 = vmul.f32 %v661_v21, %v3271_v11  ;;  %v665_v29 = vmul.f32 %v661_v21, %v3274_v12 }
  0x65   : > { %v533_v30 = vpack.c.bf16 %v531_v23, %v530_v22  ;;  %v522_v31 = vpack.c.bf16 %v520_v25, %v519_v24  ;;  %v528_v32 = vmul.f32 %v527_v18, %v3267_v9  ;;  %v529_v33 = vmul.f32 %v527_v18, %v3269_v10 }
  0x66   : > { %v616_v34 = vpack.c.bf16 %v614_v27, %v613_v26  ;;  %v667_v35 = vpack.c.bf16 %v665_v29, %v664_v28  ;;  %v517_v36 = vmul.f32 %v516_v19, %v3267_v9  ;;  %v518_v37 = vmul.f32 %v516_v19, %v3269_v10 }
  0x67   : > { %562 = vmatpush.bf16.msra.mxu0 %v533_v30  ;;  %597 = vmatpush.bf16.msra.mxu1 %v522_v31  ;;  %v532_v38 = vpack.c.bf16 %v529_v33, %v528_v32  ;;  %v611_v39 = vmul.f32 %v610_v20, %v3267_v9  ;;  %v612_v40 = vmul.f32 %v610_v20, %v3269_v10 }
  0x68   : > { %644 = vmatpush.bf16.msra.mxu2 %v616_v34  ;;  %695 = vmatpush.bf16.msra.mxu3 %v667_v35  ;;  %v521_v41 = vpack.c.bf16 %v518_v37, %v517_v36  ;;  %v662_v42 = vmul.f32 %v661_v21, %v3267_v9  ;;  %v663_v43 = vmul.f32 %v661_v21, %v3269_v10 }
  0x69   : > { %v615_v44 = vpack.c.bf16 %v612_v40, %v611_v39 }
  0x6a   : > { %v666_v45 = vpack.c.bf16 %v663_v43, %v662_v42 }
  0x6b   : > { %563 = vmatpush.bf16.msra.mxu0 %v532_v38  ;;  %598 = vmatpush.bf16.msra.mxu1 %v521_v41 }
  0x6c   : > { %645 = vmatpush.bf16.msra.mxu2 %v615_v44  ;;  %696 = vmatpush.bf16.msra.mxu3 %v666_v45 }
  0x6e   : > { %2180 = vmatmul.msk.bf16.vlgmr.msra.gmra.mxu0 %vm549_vm0, %v2566_v46  ;;  %2190 = vmatmul.msk.bf16.vlgmr.msra.gmra.mxu1 %vm549_vm0, %v2564_v47 }
  0x6f   : > { %2204 = vmatmul.msk.bf16.vlgmr.msra.gmra.mxu2 %vm549_vm0, %v2568_v48  ;;  %2218 = vmatmul.msk.bf16.vlgmr.msra.gmra.mxu3 %vm549_vm0, %v2570_v49 }
  0x7e   : > { %2181 = vmatmul.msk.bf16.gmra.mxu0 %vm549_vm0, %v2567_v50  ;;  %2191 = vmatmul.msk.bf16.gmra.mxu1 %vm549_vm0, %v2565_v51 }
  0x7f   : > { %2205 = vmatmul.msk.bf16.gmra.mxu2 %vm549_vm0, %v2569_v52  ;;  %2219 = vmatmul.msk.bf16.gmra.mxu3 %vm549_vm0, %v2571_v53 }
  0xeb   : > { %v565_v54 = vpop.f32.mrf.mxu0  ;;  %v600_v55 = vpop.f32.mrf.mxu1 }
  0xec   : > { %v601_v56 = vadd.f32 %v600_v55, %v565_v54 }
  0xf2   : > { %v647_v57 = vpop.f32.mrf.mxu2  ;;  %v698_v58 = vpop.f32.mrf.mxu3 }
  0xf3   : > { %v657_v59 = vadd.f32 %v647_v57, %v601_v56  ;;  %v567_v60 = vpop.f32.mrf.mxu0  ;;  %v602_v61 = vpop.f32.mrf.mxu1 }
  0xf4   : > { %v603_v1 = vadd.f32 %v602_v61, %v567_v60 }
  0xf5   : > { %v708_v62 = vadd.f32 %v698_v58, %v657_v59 }
  0xf7   : > { %v712_v63 = vadd.f32 %v708_v62, %v3267_v9 }
  0xf9   : > { %v716_v0 = vmax.f32 %v712_v63, 0.0 }
  0xfa   : > { %v649_v2 = vpop.f32.mrf.mxu2  ;;  %v700_v3 = vpop.f32.mrf.mxu3 }
  0xfb   : > { %v720_v4 = vadd.f32 %v716_v0, %v708_v62  ;;  %v658_v5 = vadd.f32 %v649_v2, %v603_v1  ;;  %v570_v6 = vpop.f32.mrf.mxu0  ;;  %v605_v7 = vpop.f32.mrf.mxu1 }
  0xfc   : > { %v606_v20 = vadd.f32 %v605_v7, %v570_v6 }
  0xfd   : > { %v724_v8 = vmax.f32 %v720_v4, 0.0  ;;  %v709_v17 = vadd.f32 %v700_v3, %v658_v5 }
  0xff   : > { %v728_v18 = vadd.f32 %v724_v8, %v708_v62  ;;  %v713_v19 = vadd.f32 %v709_v17, %v3269_v10 }
 0x101   : > { %v732_v21 = vmax.f32 %v728_v18, 0.0  ;;  %v717_v22 = vmax.f32 %v713_v19, 0.0 }
 0x102   : > { %v652_v23 = vpop.f32.mrf.mxu2  ;;  %v703_v24 = vpop.f32.mrf.mxu3 }
 0x103   : > { %736 = vst [vmem:[#allocation13] sm:$0xff] %v732_v21  ;;  %v721_v25 = vadd.f32 %v717_v22, %v709_v17  ;;  %v659_v26 = vadd.f32 %v652_v23, %v606_v20  ;;  %v572_v29 = vpop.f32.mrf.mxu0  ;;  %v607_v30 = vpop.f32.mrf.mxu1 }
 0x104   : > { %v608_v35 = vadd.f32 %v607_v30, %v572_v29 }
 0x105   : > { %v725_v27 = vmax.f32 %v721_v25, 0.0  ;;  %v710_v28 = vadd.f32 %v703_v24, %v659_v26 }
 0x107   : > { %v729_v31 = vadd.f32 %v725_v27, %v709_v17  ;;  %v714_v32 = vadd.f32 %v710_v28, %v3271_v11 }
 0x109   : > { %v733_v33 = vmax.f32 %v729_v31, 0.0  ;;  %v718_v34 = vmax.f32 %v714_v32, 0.0 }
 0x10a   : > { %v654_v36 = vpop.f32.mrf.mxu2  ;;  %v705_v39 = vpop.f32.mrf.mxu3 }
 0x10b   : > { %737 = vst [vmem:[#allocation13 + $0x8] sm:$0xff] %v733_v33  ;;  %v722_v37 = vadd.f32 %v718_v34, %v710_v28  ;;  %v660_v38 = vadd.f32 %v654_v36, %v608_v35 }
 0x10d   : > { %v726_v40 = vmax.f32 %v722_v37, 0.0  ;;  %v711_v41 = vadd.f32 %v705_v39, %v660_v38 }
 0x10f   : > { %v730_v42 = vadd.f32 %v726_v40, %v710_v28  ;;  %v715_v43 = vadd.f32 %v711_v41, %v3274_v12 }
 0x111   : > { %v734_v44 = vmax.f32 %v730_v42, 0.0  ;;  %v719_v45 = vmax.f32 %v715_v43, 0.0 }
 0x113   : > { %738 = vst [vmem:[#allocation13 + $0x10] sm:$0xff] %v734_v44  ;;  %v723_v46 = vadd.f32 %v719_v45, %v711_v41 }
 0x115   : > { %v727_v47 = vmax.f32 %v723_v46, 0.0 }
 0x117   : > { %v731_v48 = vadd.f32 %v727_v47, %v711_v41 }
 0x119   : > { %v735_v49 = vmax.f32 %v731_v48, 0.0 }
 0x11b   : > { %739 = vst [vmem:[#allocation13 + $0x18] sm:$0xff] %v735_v49 }
 0x11c PF: > { %v2350_v50 = vld [vmem:[#allocation11 + $0xe0] sm:$0xf]  ;;  %v2606_v51 = vld [vmem:[#allocation11 + $0xec] sm:$0xf0]  ;;  %v2604_v52 = vld [vmem:[#allocation11 + $0xe4] sm:$0xf] }
 0x11d   : > { %v2351_v53 = vor.u32 %v2606_v51, %v2350_v50  ;;  %v2352_v54 = vld [vmem:[#allocation11 + $0xf0] sm:$0xf0]  ;;  %v2636_v55 = vld [vmem:[#allocation11 + $0x1e4] sm:$0xf]  ;;  %v2478_v59 = vld [vmem:[#allocation11 + $0x1e0] sm:$0xf] }
 0x11e   : > { %v2480_v56 = vld [vmem:[#allocation11 + $0x1f0] sm:$0xf0]  ;;  %v2355_v57 = vor.u32 %v2604_v52, %v2352_v54  ;;  %v2638_v60 = vld [vmem:[#allocation11 + $0x1ec] sm:$0xf0]  ;;  %v2334_v61 = vld [vmem:[#allocation11 + $0xc0] sm:$0xf] }
 0x11f   : > { %v2483_v58 = vor.u32 %v2636_v55, %v2480_v56  ;;  %1178 = vmatpush.bf16.msra.mxu0 %v2351_v53  ;;  %v2479_v62 = vor.u32 %v2638_v60, %v2478_v59  ;;  %v2602_v63 = vld [vmem:[#allocation11 + $0xcc] sm:$0xf0]  ;;  %v2600_v0 = vld [vmem:[#allocation11 + $0xc4] sm:$0xf]  ;;  %v2336_v1 = vld [vmem:[#allocation11 + $0xd0] sm:$0xf0]  ;;  %v752_v60 = vpack.c.bf16 %v3267_v9, %v3267_v9 }
 0x120   : > { %1216 = vmatpush.bf16.msra.mxu2 %v2355_v57  ;;  %v2335_v2 = vor.u32 %v2602_v63, %v2334_v61  ;;  %v2339_v3 = vor.u32 %v2600_v0, %v2336_v1  ;;  %v2632_v4 = vld [vmem:[#allocation11 + $0x1c4] sm:$0xf]  ;;  %v2464_v5 = vld [vmem:[#allocation11 + $0x1d0] sm:$0xf0]  ;;  %v2462_v6 = vld [vmem:[#allocation11 + $0x1c0] sm:$0xf]  ;;  %v753_v63 = vpack.c.bf16 %v3269_v10, %v3269_v10 }
 0x121   : > { %1235 = vmatpush.bf16.msra.mxu3 %v2483_v58  ;;  %1197 = vmatpush.bf16.msra.mxu1 %v2479_v62  ;;  %v2467_v7 = vor.u32 %v2632_v4, %v2464_v5  ;;  %v2634_v8 = vld [vmem:[#allocation11 + $0x1cc] sm:$0xf0]  ;;  %v2318_v17 = vld [vmem:[#allocation11 + $0xa0] sm:$0xf]  ;;  %v2596_v20 = vld [vmem:[#allocation11 + $0xa4] sm:$0xf] }
 0x122   : > { %v2598_v18 = vld [vmem:[#allocation11 + $0xac] sm:$0xf0]  ;;  %v2463_v19 = vor.u32 %v2634_v8, %v2462_v6  ;;  %v2320_v21 = vld [vmem:[#allocation11 + $0xb0] sm:$0xf0]  ;;  %v2628_v22 = vld [vmem:[#allocation11 + $0x1a4] sm:$0xf] }
 0x123   : > { %1179 = vmatpush.bf16.msra.mxu0 %v2335_v2  ;;  %v2319_v23 = vor.u32 %v2598_v18, %v2318_v17  ;;  %v2448_v24 = vld [vmem:[#allocation11 + $0x1b0] sm:$0xf0]  ;;  %v2446_v25 = vld [vmem:[#allocation11 + $0x1a0] sm:$0xf]  ;;  %v2630_v26 = vld [vmem:[#allocation11 + $0x1ac] sm:$0xf0]  ;;  %v2323_v27 = vor.u32 %v2596_v20, %v2320_v21 }
 0x124   : > { %1217 = vmatpush.bf16.msra.mxu2 %v2339_v3  ;;  %v2451_v28 = vor.u32 %v2628_v22, %v2448_v24  ;;  %v2302_v29 = vld [vmem:[#allocation11 + $0x80] sm:$0xf]  ;;  %v2594_v30 = vld [vmem:[#allocation11 + $0x8c] sm:$0xf0]  ;;  %v2592_v31 = vld [vmem:[#allocation11 + $0x84] sm:$0xf]  ;;  %v2447_v32 = vor.u32 %v2630_v26, %v2446_v25 }
 0x125   : > { %1236 = vmatpush.bf16.msra.mxu3 %v2467_v7  ;;  %1198 = vmatpush.bf16.msra.mxu1 %v2463_v19  ;;  %v2304_v33 = vld [vmem:[#allocation11 + $0x90] sm:$0xf0]  ;;  %v2624_v34 = vld [vmem:[#allocation11 + $0x184] sm:$0xf]  ;;  %v2430_v36 = vld [vmem:[#allocation11 + $0x180] sm:$0xf]  ;;  %v2303_v38 = vor.u32 %v2594_v30, %v2302_v29 }
 0x126   : > { %v2432_v35 = vld [vmem:[#allocation11 + $0x190] sm:$0xf0]  ;;  %v2626_v37 = vld [vmem:[#allocation11 + $0x18c] sm:$0xf0]  ;;  %v2307_v39 = vor.u32 %v2592_v31, %v2304_v33  ;;  %v2286_v41 = vld [vmem:[#allocation11 + $0x60] sm:$0xf] }
 0x127   : > { %1180 = vmatpush.bf16.msra.mxu0 %v2319_v23  ;;  %v2435_v40 = vor.u32 %v2624_v34, %v2432_v35  ;;  %v2590_v42 = vld [vmem:[#allocation11 + $0x6c] sm:$0xf0]  ;;  %v2588_v43 = vld [vmem:[#allocation11 + $0x64] sm:$0xf]  ;;  %v2431_v44 = vor.u32 %v2626_v37, %v2430_v36  ;;  %v2288_v45 = vld [vmem:[#allocation11 + $0x70] sm:$0xf0] }
 0x128   : > { %1218 = vmatpush.bf16.msra.mxu2 %v2323_v27  ;;  %v2620_v46 = vld [vmem:[#allocation11 + $0x164] sm:$0xf]  ;;  %v2416_v47 = vld [vmem:[#allocation11 + $0x170] sm:$0xf0]  ;;  %v2414_v48 = vld [vmem:[#allocation11 + $0x160] sm:$0xf]  ;;  %v2287_v50 = vor.u32 %v2590_v42, %v2286_v41  ;;  %v2291_v51 = vor.u32 %v2588_v43, %v2288_v45 }
 0x129   : > { %1237 = vmatpush.bf16.msra.mxu3 %v2451_v28  ;;  %1199 = vmatpush.bf16.msra.mxu1 %v2447_v32  ;;  %v2622_v49 = vld [vmem:[#allocation11 + $0x16c] sm:$0xf0]  ;;  %v2419_v52 = vor.u32 %v2620_v46, %v2416_v47  ;;  %v2270_v53 = vld [vmem:[#allocation11 + $0x40] sm:$0xf]  ;;  %v2584_v55 = vld [vmem:[#allocation11 + $0x44] sm:$0xf] }
 0x12a   : > { %v2586_v54 = vld [vmem:[#allocation11 + $0x4c] sm:$0xf0]  ;;  %v2415_v56 = vor.u32 %v2622_v49, %v2414_v48  ;;  %v2272_v57 = vld [vmem:[#allocation11 + $0x50] sm:$0xf0]  ;;  %v2616_v58 = vld [vmem:[#allocation11 + $0x144] sm:$0xf] }
 0x12b   : > { %1181 = vmatpush.bf16.msra.mxu0 %v2303_v38  ;;  %v2400_v59 = vld [vmem:[#allocation11 + $0x150] sm:$0xf0]  ;;  %v2398_v61 = vld [vmem:[#allocation11 + $0x140] sm:$0xf]  ;;  %v2618_v62 = vld [vmem:[#allocation11 + $0x14c] sm:$0xf0]  ;;  %v2271_v0 = vor.u32 %v2586_v54, %v2270_v53  ;;  %v2275_v4 = vor.u32 %v2584_v55, %v2272_v57 }
 0x12c   : > { %1219 = vmatpush.bf16.msra.mxu2 %v2307_v39  ;;  %v2254_v1 = vld [vmem:[#allocation11 + $0x20] sm:$0xf]  ;;  %v2582_v2 = vld [vmem:[#allocation11 + $0x2c] sm:$0xf0]  ;;  %v2580_v3 = vld [vmem:[#allocation11 + $0x24] sm:$0xf]  ;;  %v2403_v5 = vor.u32 %v2616_v58, %v2400_v59  ;;  %v2399_v17 = vor.u32 %v2618_v62, %v2398_v61  ;;  %v754_v58 = vpack.c.bf16 %v3271_v11, %v3271_v11  ;;  %v755_v62 = vpack.c.bf16 %v3274_v12, %v3274_v12 }
 0x12d   : > { %1238 = vmatpush.bf16.msra.mxu3 %v2435_v40  ;;  %1200 = vmatpush.bf16.msra.mxu1 %v2431_v44  ;;  %v2256_v6 = vld [vmem:[#allocation11 + $0x30] sm:$0xf0]  ;;  %v2612_v7 = vld [vmem:[#allocation11 + $0x124] sm:$0xf]  ;;  %v2382_v9 = vld [vmem:[#allocation11 + $0x120] sm:$0xf]  ;;  %v2255_v23 = vor.u32 %v2582_v2, %v2254_v1 }
 0x12e   : > { %v2384_v8 = vld [vmem:[#allocation11 + $0x130] sm:$0xf0]  ;;  %v740_v18 = vld [vmem:[#allocation13] sm:$0xff]  ;;  %v741_v19 = vld [vmem:[#allocation13 + $0x8] sm:$0xff]  ;;  %756 = vst [vmem:[#allocation3 + $0x4] sm:$0xf] %v752_v60  ;;  %v2259_v27 = vor.u32 %v2580_v3, %v2256_v6 }
 0x12f   : > { %1182 = vmatpush.bf16.msra.mxu0 %v2287_v50  ;;  %v2614_v20 = vld [vmem:[#allocation11 + $0x12c] sm:$0xf0]  ;;  %v2238_v10 = vld [vmem:[#allocation11] sm:$0xf]  ;;  %v744_v21 = vpack.c.bf16 %v740_v18, %v740_v18  ;;  %v745_v22 = vpack.c.bf16 %v741_v19, %v741_v19  ;;  %757 = vst [vmem:[#allocation3 + $0xc] sm:$0xf] %v753_v63  ;;  %v2387_v28 = vor.u32 %v2612_v7, %v2384_v8 }
 0x130   : > { %1220 = vmatpush.bf16.msra.mxu2 %v2291_v51  ;;  %v2578_v24 = vld [vmem:[#allocation11 + $0xc] sm:$0xf0]  ;;  %v2576_v25 = vld [vmem:[#allocation11 + $0x4] sm:$0xf]  ;;  %v2240_v26 = vld [vmem:[#allocation11 + $0x10] sm:$0xf0]  ;;  %v2383_v31 = vor.u32 %v2614_v20, %v2382_v9 }
 0x131   : > { %1239 = vmatpush.bf16.msra.mxu3 %v2419_v52  ;;  %1201 = vmatpush.bf16.msra.mxu1 %v2415_v56  ;;  %v2608_v29 = vld [vmem:[#allocation11 + $0x104] sm:$0xf]  ;;  %v2368_v30 = vld [vmem:[#allocation11 + $0x110] sm:$0xf0]  ;;  %748 = vst [vmem:[#allocation3] sm:$0xf] %v744_v21  ;;  %v2239_v37 = vor.u32 %v2578_v24, %v2238_v10  ;;  %v2243_v41 = vor.u32 %v2576_v25, %v2240_v26 }
 0x132   : > { %v2366_v32 = vld [vmem:[#allocation11 + $0x100] sm:$0xf]  ;;  %v2610_v33 = vld [vmem:[#allocation11 + $0x10c] sm:$0xf0]  ;;  %749 = vst [vmem:[#allocation3 + $0x8] sm:$0xf] %v745_v22  ;;  %v2371_v42 = vor.u32 %v2608_v29, %v2368_v30 }
 0x133   : > { %1183 = vmatpush.bf16.msra.mxu0 %v2271_v0  ;;  %v2605_v34 = vld [vmem:[#allocation11 + $0xec] sm:$0xf]  ;;  %v2360_v35 = vld [vmem:[#allocation11 + $0xf8] sm:$0xf0]  ;;  %v2358_v36 = vld [vmem:[#allocation11 + $0xe8] sm:$0xf]  ;;  %v2367_v45 = vor.u32 %v2610_v33, %v2366_v32 }
 0x134   : > { %1221 = vmatpush.bf16.msra.mxu2 %v2275_v4  ;;  %v2607_v38 = vld [vmem:[#allocation11 + $0xf4] sm:$0xf0]  ;;  %v2637_v39 = vld [vmem:[#allocation11 + $0x1ec] sm:$0xf]  ;;  %v2488_v40 = vld [vmem:[#allocation11 + $0x1f8] sm:$0xf0]  ;;  %v2363_v48 = vor.u32 %v2605_v34, %v2360_v35 }
 0x135   : > { %1240 = vmatpush.bf16.msra.mxu3 %v2403_v5  ;;  %1202 = vmatpush.bf16.msra.mxu1 %v2399_v17  ;;  %v2486_v43 = vld [vmem:[#allocation11 + $0x1e8] sm:$0xf]  ;;  %v2639_v44 = vld [vmem:[#allocation11 + $0x1f4] sm:$0xf0]  ;;  %v2572_v46 = vld [vmem:[#allocation3 + $0x4] sm:$0xf]  ;;  %v2359_v50 = vor.u32 %v2607_v38, %v2358_v36  ;;  %v2491_v51 = vor.u32 %v2637_v39, %v2488_v40 }
 0x136   : > { %v2224_v47 = vld [vmem:[#allocation3 + $0x8] sm:$0xf0]  ;;  %v2344_v52 = vld [vmem:[#allocation11 + $0xd8] sm:$0xf0]  ;;  %v2342_v53 = vld [vmem:[#allocation11 + $0xc8] sm:$0xf]  ;;  %v2487_v0 = vor.u32 %v2639_v44, %v2486_v43 }
 0x137   : > { %1184 = vmatpush.bf16.msra.mxu0 %v2255_v23  ;;  %v2601_v49 = vld [vmem:[#allocation11 + $0xcc] sm:$0xf]  ;;  %v2603_v54 = vld [vmem:[#allocation11 + $0xd4] sm:$0xf0]  ;;  %v2472_v57 = vld [vmem:[#allocation11 + $0x1d8] sm:$0xf0]  ;;  %v3329_v60 = vor.u32 %v2572_v46, %v2224_v47 }
 0x138   : > { %1222 = vmatpush.bf16.msra.mxu2 %v2259_v27  ;;  %v2222_v55 = vld [vmem:[#allocation3] sm:$0xf]  ;;  %v2633_v56 = vld [vmem:[#allocation11 + $0x1cc] sm:$0xf]  ;;  %v2470_v61 = vld [vmem:[#allocation11 + $0x1c8] sm:$0xf]  ;;  %v2347_v1 = vor.u32 %v2601_v49, %v2344_v52  ;;  %v2343_v11 = vor.u32 %v2603_v54, %v2342_v53 }
 0x139   : > { %1241 = vmatpush.bf16.msra.mxu3 %v2387_v28  ;;  %1203 = vmatpush.bf16.msra.mxu1 %v2383_v31  ;;  %v2573_v59 = vld [vmem:[#allocation3 + $0x4] sm:$0xf0]  ;;  %v2635_v2 = vld [vmem:[#allocation11 + $0x1d4] sm:$0xf0]  ;;  %v2597_v3 = vld [vmem:[#allocation11 + $0xac] sm:$0xf]  ;;  %v2475_v5 = vor.u32 %v2633_v56, %v2472_v57 }
 0x13a   : > { %v3333_v63 = vor.u32 %v2573_v59, %v2222_v55  ;;  %v2328_v4 = vld [vmem:[#allocation11 + $0xb8] sm:$0xf0]  ;;  %v2326_v6 = vld [vmem:[#allocation11 + $0xa8] sm:$0xf]  ;;  %v2599_v7 = vld [vmem:[#allocation11 + $0xb4] sm:$0xf0]  ;;  %v2471_v10 = vor.u32 %v2635_v2, %v2470_v61 }
 0x13b   : > { %1185 = vmatpush.bf16.msra.mxu0 %v2239_v37  ;;  %v2629_v8 = vld [vmem:[#allocation11 + $0x1ac] sm:$0xf]  ;;  %v2456_v12 = vld [vmem:[#allocation11 + $0x1b8] sm:$0xf0]  ;;  %v3337_v17 = vld [vmem:[#allocation13 + $0x10] sm:$0xff]  ;;  %v2331_v21 = vor.u32 %v2597_v3, %v2328_v4  ;;  %v2327_v25 = vor.u32 %v2599_v7, %v2326_v6  ;;  %s3368_s11 = sshll.u32 %s3165_s2, 7 }
 0x13c   : > { %1223 = vmatpush.bf16.msra.mxu2 %v2243_v41  ;;  %v3339_v9 = vld [vmem:[#allocation13 + $0x18] sm:$0xff]  ;;  %758 = vst [vmem:[#allocation3 + $0x14] sm:$0xf] %v754_v58  ;;  %v2454_v18 = vld [vmem:[#allocation11 + $0x1a8] sm:$0xf]  ;;  %v746_v19 = vpack.c.bf16 %v3337_v17, %v3337_v17  ;;  %v2459_v26 = vor.u32 %v2629_v8, %v2456_v12 }
 0x13d   : > { %1242 = vmatpush.bf16.msra.mxu3 %v2371_v42  ;;  %1204 = vmatpush.bf16.msra.mxu1 %v2367_v45  ;;  %v747_v20 = vpack.c.bf16 %v3339_v9, %v3339_v9  ;;  %759 = vst [vmem:[#allocation3 + $0x1c] sm:$0xf] %v755_v62  ;;  %v2631_v22 = vld [vmem:[#allocation11 + $0x1b4] sm:$0xf0]  ;;  %v2593_v23 = vld [vmem:[#allocation11 + $0x8c] sm:$0xf] }
 0x13e   : > { %1186 = vmatmul.bf16.vlgmr.msra.gmra.mxu0 %v3333_v63  ;;  %v2312_v24 = vld [vmem:[#allocation11 + $0x98] sm:$0xf0]  ;;  %v2310_v27 = vld [vmem:[#allocation11 + $0x88] sm:$0xf]  ;;  %v2595_v28 = vld [vmem:[#allocation11 + $0x94] sm:$0xf0]  ;;  %v2455_v31 = vor.u32 %v2631_v22, %v2454_v18 }
 0x13f   : > { %1254 = vmatpush.bf16.msrb.mxu0 %v2359_v50  ;;  %1224 = vmatmul.bf16.vlgmr.msra.gmra.mxu2 %v3333_v63  ;;  %750 = vst [vmem:[#allocation3 + $0x10] sm:$0xf] %v746_v19  ;;  %v2625_v29 = vld [vmem:[#allocation11 + $0x18c] sm:$0xf]  ;;  %v2440_v30 = vld [vmem:[#allocation11 + $0x198] sm:$0xf0]  ;;  %v2315_v32 = vor.u32 %v2593_v23, %v2312_v24  ;;  %v2311_v35 = vor.u32 %v2595_v28, %v2310_v27 }
 0x140   : > { %1292 = vmatpush.bf16.msrb.mxu2 %v2363_v48  ;;  %1243 = vmatmul.bf16.vlgmr.msra.gmra.mxu3 %v3329_v60  ;;  %751 = vst [vmem:[#allocation3 + $0x18] sm:$0xf] %v747_v20  ;;  %v2438_v33 = vld [vmem:[#allocation11 + $0x188] sm:$0xf]  ;;  %v2627_v34 = vld [vmem:[#allocation11 + $0x194] sm:$0xf0]  ;;  %v2443_v36 = vor.u32 %v2625_v29, %v2440_v30 }
 0x141   : > { %1311 = vmatpush.bf16.msrb.mxu3 %v2491_v51  ;;  %1205 = vmatmul.bf16.vlgmr.msra.gmra.mxu1 %v3329_v60  ;;  %v2589_v37 = vld [vmem:[#allocation11 + $0x6c] sm:$0xf]  ;;  %v2296_v38 = vld [vmem:[#allocation11 + $0x78] sm:$0xf0]  ;;  %v2294_v39 = vld [vmem:[#allocation11 + $0x68] sm:$0xf]  ;;  %v2439_v46 = vor.u32 %v2627_v34, %v2438_v33 }
 0x142   : > { %1273 = vmatpush.bf16.msrb.mxu1 %v2487_v0  ;;  %v2591_v40 = vld [vmem:[#allocation11 + $0x74] sm:$0xf0]  ;;  %v2621_v41 = vld [vmem:[#allocation11 + $0x16c] sm:$0xf]  ;;  %v2424_v42 = vld [vmem:[#allocation11 + $0x178] sm:$0xf0]  ;;  %v2299_v50 = vor.u32 %v2589_v37, %v2296_v38 }
 0x143   : > { %1255 = vmatpush.bf16.msrb.mxu0 %v2343_v11  ;;  %v2422_v43 = vld [vmem:[#allocation11 + $0x168] sm:$0xf]  ;;  %v2623_v44 = vld [vmem:[#allocation11 + $0x174] sm:$0xf0]  ;;  %v2585_v45 = vld [vmem:[#allocation11 + $0x4c] sm:$0xf]  ;;  %v2295_v52 = vor.u32 %v2591_v40, %v2294_v39  ;;  %v2427_v53 = vor.u32 %v2621_v41, %v2424_v42 }
 0x144   : > { %1293 = vmatpush.bf16.msrb.mxu2 %v2347_v1  ;;  %v2574_v48 = vld [vmem:[#allocation3 + $0x14] sm:$0xf]  ;;  %v2232_v49 = vld [vmem:[#allocation3 + $0x18] sm:$0xf0]  ;;  %v2278_v55 = vld [vmem:[#allocation11 + $0x48] sm:$0xf]  ;;  %v2423_v62 = vor.u32 %v2623_v44, %v2422_v43 }
 0x145   : > { %1312 = vmatpush.bf16.msrb.mxu3 %v2475_v5  ;;  %v2280_v54 = vld [vmem:[#allocation11 + $0x58] sm:$0xf0]  ;;  %v2587_v57 = vld [vmem:[#allocation11 + $0x54] sm:$0xf0]  ;;  %v2617_v58 = vld [vmem:[#allocation11 + $0x14c] sm:$0xf]  ;;  %v3349_v61 = vor.u32 %v2574_v48, %v2232_v49 }
 0x146   : > { %1274 = vmatpush.bf16.msrb.mxu1 %v2471_v10  ;;  %v2230_v47 = vld [vmem:[#allocation3 + $0x10] sm:$0xf]  ;;  %v2408_v59 = vld [vmem:[#allocation11 + $0x158] sm:$0xf0]  ;;  %v2283_v0 = vor.u32 %v2585_v45, %v2280_v54  ;;  %v2406_v1 = vld [vmem:[#allocation11 + $0x148] sm:$0xf]  ;;  %v2279_v3 = vor.u32 %v2587_v57, %v2278_v55 }
 0x147   : > { %1256 = vmatpush.bf16.msrb.mxu0 %v2327_v25  ;;  %v2575_v51 = vld [vmem:[#allocation3 + $0x14] sm:$0xf0]  ;;  %v2411_v4 = vor.u32 %v2617_v58, %v2408_v59  ;;  %v2581_v11 = vld [vmem:[#allocation11 + $0x2c] sm:$0xf]  ;;  %v2264_v5 = vld [vmem:[#allocation11 + $0x38] sm:$0xf0] }
 0x148   : > { %1294 = vmatpush.bf16.msrb.mxu2 %v2331_v21  ;;  %v3347_v56 = vor.u32 %v2575_v51, %v2230_v47  ;;  %v2619_v2 = vld [vmem:[#allocation11 + $0x154] sm:$0xf0]  ;;  %v2262_v6 = vld [vmem:[#allocation11 + $0x28] sm:$0xf]  ;;  %v2613_v8 = vld [vmem:[#allocation11 + $0x12c] sm:$0xf]  ;;  %v2267_v23 = vor.u32 %v2581_v11, %v2264_v5 }
 0x149   : > { %1313 = vmatpush.bf16.msrb.mxu3 %v2459_v26  ;;  %v2583_v7 = vld [vmem:[#allocation11 + $0x34] sm:$0xf0]  ;;  %v2392_v12 = vld [vmem:[#allocation11 + $0x138] sm:$0xf0]  ;;  %v2390_v18 = vld [vmem:[#allocation11 + $0x128] sm:$0xf]  ;;  %v2407_v22 = vor.u32 %v2619_v2, %v2406_v1 }
 0x14a   : > { %1275 = vmatpush.bf16.msrb.mxu1 %v2455_v31  ;;  %v2615_v19 = vld [vmem:[#allocation11 + $0x134] sm:$0xf0]  ;;  %v2577_v20 = vld [vmem:[#allocation11 + $0xc] sm:$0xf]  ;;  %v2248_v24 = vld [vmem:[#allocation11 + $0x18] sm:$0xf0]  ;;  %v2263_v26 = vor.u32 %v2583_v7, %v2262_v6  ;;  %v2395_v27 = vor.u32 %v2613_v8, %v2392_v12 }
 0x14b   : > { %1257 = vmatpush.bf16.msrb.mxu0 %v2311_v35  ;;  %v1582_v10 = vld [vmem:[%s3239_s28] sm:$0xff]  ;;  %v1584_v21 = vld [vmem:[%s3239_s28 + $0x10] sm:$0xff]  ;;  %v3051_v30 = vmov 0   ;;  %v1583_v34 = vld [vmem:[%s3239_s28 + $0x8] sm:$0xff]  ;;  %v2251_v37 = vor.u32 %v2577_v20, %v2248_v24 }
 0x14c   : > { %1295 = vmatpush.bf16.msrb.mxu2 %v2315_v32  ;;  %v2246_v25 = vld [vmem:[#allocation11 + $0x8] sm:$0xf]  ;;  %vm1586_vm1 = vcmp.gt.f32.partialorder %v1582_v10, 0.0  ;;  %vm1588_vm2 = vcmp.gt.f32.partialorder %v1584_v21, 0.0  ;;  %v2579_v28 = vld [vmem:[#allocation11 + $0x14] sm:$0xf0]  ;;  %2740 = vset.pattern.permute.xlu0 %v3051_v30 }
 0x14d   : > { %1314 = vmatpush.bf16.msrb.mxu3 %v2443_v36  ;;  %v2609_v29 = vld [vmem:[#allocation11 + $0x10c] sm:$0xf]  ;;  %v1590_v31 = vsel %vm1586_vm1, 1, %v3051_v30  ;;  %v1592_v32 = vsel %vm1588_vm2, 1, %v3051_v30  ;;  %v2376_v33 = vld [vmem:[#allocation11 + $0x118] sm:$0xf0]  ;;  %2741 = vset.pattern.permute.xlu1 %v3051_v30  ;;  %v2391_v36 = vor.u32 %v2615_v19, %v2390_v18  ;;  %v2247_v38 = vor.u32 %v2579_v28, %v2246_v25 }
 0x14e   : > { %1276 = vmatpush.bf16.msrb.mxu1 %v2439_v46  ;;  %1191 = vmatmul.bf16.gmra.mxu0 %v3347_v56  ;;  %v1585_v35 = vld [vmem:[%s3239_s28 + $0x18] sm:$0xff]  ;;  %v2379_v39 = vor.u32 %v2609_v29, %v2376_v33  ;;  %v2374_v40 = vld [vmem:[#allocation11 + $0x108] sm:$0xf]  ;;  %v2611_v41 = vld [vmem:[#allocation11 + $0x114] sm:$0xf0]  ;;  %vm1587_vm3 = vcmp.gt.f32.partialorder %v1583_v34, 0.0 }
 0x14f   : > { %1258 = vmatpush.bf16.msrb.mxu0 %v2295_v52  ;;  %1229 = vmatmul.bf16.gmra.mxu2 %v3347_v56  ;;  %vm1589_vm4 = vcmp.gt.f32.partialorder %v1585_v35, 0.0  ;;  %v2375_v42 = vor.u32 %v2611_v41, %v2374_v40  ;;  %v1591_v43 = vsel %vm1587_vm3, 1, %v3051_v30  ;;  %s3371_s28 = sld [smem:[#allocation7 + %s3368_s11]] }
 0x150   : > { %1296 = vmatpush.bf16.msrb.mxu2 %v2299_v50  ;;  %1248 = vmatmul.bf16.gmra.mxu3 %v3349_v61  ;;  %v1593_v44 = vsel %vm1589_vm4, 1, %v3051_v30 }
 0x151   : > { %1315 = vmatpush.bf16.msrb.mxu3 %v2427_v53  ;;  %1210 = vmatmul.bf16.gmra.mxu1 %v3349_v61 }
 0x152   : > { %1277 = vmatpush.bf16.msrb.mxu1 %v2423_v62  ;;  %1595 = vperm.xlu0 %2740, %v1590_v31  }
 0x153   : > { %1259 = vmatpush.bf16.msrb.mxu0 %v2279_v3  ;;  %1601 = vperm.xlu1 %2741, %v1592_v32  }
 0x154   : > { %1297 = vmatpush.bf16.msrb.mxu2 %v2283_v0 }
 0x155   : > { %1316 = vmatpush.bf16.msrb.mxu3 %v2411_v4  ;;  %p2505_p4 = scmp.lt.s32.totalorder %s3371_s28, 0 }
 0x156   : > { %1278 = vmatpush.bf16.msrb.mxu1 %v2407_v22  ;;  %s1632_s20 = scalar_lea.vmem (!%p2505_p4), [#allocation13], %s3371_s28 }
 0x157   : > { %1260 = vmatpush.bf16.msrb.mxu0 %v2263_v26 }
 0x158   : > { %1298 = vmatpush.bf16.msrb.mxu2 %v2267_v23 }
 0x159   : > { %1317 = vmatpush.bf16.msrb.mxu3 %v2395_v27 }
 0x15a   : > { %1279 = vmatpush.bf16.msrb.mxu1 %v2391_v36  ;;  %1598 = vperm.xlu0 %2740, %v1591_v43  }
 0x15b   : > { %1261 = vmatpush.bf16.msrb.mxu0 %v2247_v38  ;;  %1604 = vperm.xlu1 %2741, %v1593_v44  }
 0x15c   : > { %1299 = vmatpush.bf16.msrb.mxu2 %v2251_v37 }
 0x15d   : > { %1318 = vmatpush.bf16.msrb.mxu3 %v2379_v39 }
 0x15e   : > { %1280 = vmatpush.bf16.msrb.mxu1 %v2375_v42  ;;  %1262 = vmatmul.bf16.vlgmr.msrb.gmra.mxu0 %v3333_v63 }
 0x15f   : > { %1300 = vmatmul.bf16.vlgmr.msrb.gmra.mxu2 %v3333_v63  ;;  %v3376_v63 = vld [vmem:[%s3809_s12] sm:$0xf] }
 0x160   : > { %1319 = vmatmul.bf16.vlgmr.msrb.gmra.mxu3 %v3329_v60  ;;  %v3380_v49 = vperm.slane %v3376_v63, 1  ;;  %v3403_v36 = vperm.slane %v3376_v63, 2 }
 0x161   : > { %1281 = vmatmul.bf16.vlgmr.msrb.gmra.mxu1 %v3329_v60  ;;  %v830_v60 = vperm.slane %v3376_v63, 0 }
 0x16e   : > { %1267 = vmatmul.bf16.gmra.mxu0 %v3347_v56 }
 0x16f   : > { %1305 = vmatmul.bf16.gmra.mxu2 %v3347_v56 }
 0x170   : > { %1324 = vmatmul.bf16.gmra.mxu3 %v3349_v61 }
 0x171   : > { %1286 = vmatmul.bf16.gmra.mxu1 %v3349_v61 }
 0x1bb   : > { %v1187_v45 = vpop.f32.mrf.mxu0 }
 0x1bc   : > { %v1188_v46 = vadd.f32 %v1187_v45, %v830_v60 }
 0x1be   : > { %v1206_v47 = vpop.f32.mrf.mxu1 }
 0x1bf   : > { %v1207_v48 = vadd.f32 %v1206_v47, %v1188_v46 }
 0x1c1   : > { %v2492_v50 = vmul.f32 -1.442695, %v1207_v48 }
 0x1c2   : > { %v1225_v51 = vpop.f32.mrf.mxu2 }
 0x1c3   : > { %2742 = vpow2.f32 %v2492_v50  ;;  %v1226_v52 = vadd.f32 %v1225_v51, %v3380_v49  ;;  %v1244_v53 = vpop.f32.mrf.mxu3  ;;  %v1189_v54 = vpop.f32.mrf.mxu0 }
 0x1c4   : > { %v1190_v56 = vadd.f32 %v1189_v54, %v830_v60 }
 0x1c5   : > { %v1245_v55 = vadd.f32 %v1244_v53, %v1226_v52 }
 0x1c6   : > { %v1208_v57 = vpop.f32.mrf.mxu1 }
 0x1c7   : > { %v2496_v58 = vmul.f32 -1.442695, %v1245_v55  ;;  %v1209_v59 = vadd.f32 %v1208_v57, %v1190_v56  ;;  %v3424_v55 = vperm.slane %v3376_v63, 3 }
 0x1c9   : > { %v2743_v61 = vpop.eup %2742  ;;  %2744 = vpow2.f32 %v2496_v58  ;;  %v2493_v62 = vmul.f32 -1.442695, %v1209_v59 }
 0x1ca   : > { %v3383_v0 = vadd.f32 1.0, %v2743_v61  ;;  %v1227_v1 = vpop.f32.mrf.mxu2 }
 0x1cb   : > { %2746 = vpow2.f32 %v2493_v62  ;;  %v1228_v2 = vadd.f32 %v1227_v1, %v3380_v49  ;;  %v1246_v3 = vpop.f32.mrf.mxu3  ;;  %v1192_v4 = vpop.f32.mrf.mxu0 }
 0x1cc   : > { %2748 = vrcp.f32 %v3383_v0  ;;  %v1193_v5 = vadd.f32 %v1192_v4, %v830_v60  ;;  %v1355_v40 = vand.u32 2147483647, %v3383_v0  ;;  %vm1351_vm5 = vweird.f32 %v3383_v0 }
 0x1cd   : > { %v1247_v11 = vadd.f32 %v1246_v3, %v1228_v2  ;;  %v3433_v2 = vpop.permute.xlu0 %1595 }
 0x1ce   : > { %v1211_v6 = vpop.f32.mrf.mxu1  ;;  %vm3426_vm7 = vcmp.eq.f32.partialorder %v1355_v40, 8.507059e+37  ;;  %vm1606_vm14 = vcmp.eq.s32.totalorder %v3433_v2, 1 }
 0x1cf   : > { %v2745_v7 = vpop.eup %2744  ;;  %v2497_v8 = vmul.f32 -1.442695, %v1247_v11  ;;  %v1212_v12 = vadd.f32 %v1211_v6, %v1193_v5 }
 0x1d0   : > { %v3387_v18 = vadd.f32 1.0, %v2745_v7 }
 0x1d1   : > { %v2747_v19 = vpop.eup %2746  ;;  %2750 = vpow2.f32 %v2497_v8  ;;  %v2494_v20 = vmul.f32 -1.442695, %v1212_v12 }
 0x1d2   : > { %v3389_v10 = vpop.eup %2748  ;;  %2752 = vrcp.f32 %v3387_v18  ;;  %v3392_v21 = vadd.f32 1.0, %v2747_v19  ;;  %v1230_v22 = vpop.f32.mrf.mxu2  ;;  %v1431_v48 = vand.u32 2147483647, %v3387_v18  ;;  %v1433_v59 = vand.u32 2147483648, %v3387_v18 }
 0x1d3   : > { %v1347_v23 = vmul.f32 %v3389_v10, %v3383_v0  ;;  %2754 = vpow2.f32 %v2494_v20  ;;  %v1231_v24 = vadd.f32 %v1230_v22, %v3380_v49  ;;  %v1249_v25 = vpop.f32.mrf.mxu3  ;;  %v1194_v26 = vpop.f32.mrf.mxu0  ;;  %vm1352_vm6 = vweird.f32 %v3389_v10 }
 0x1d4   : > { %2756 = vrcp.f32 %v3392_v21  ;;  %v1195_v28 = vadd.f32 %v1194_v26, %v830_v60  ;;  %v1357_v60 = vand.u32 2147483648, %v3383_v0  ;;  %vm3437_vm8 = vmor %vm1351_vm5, %vm1352_vm6  ;;  %vm1427_vm9 = vweird.f32 %v3387_v18 }
 0x1d5   : > { %v1250_v27 = vadd.f32 %v1249_v25, %v1231_v24  ;;  %v1348_v30 = vsub.f32 1.0, %v1347_v23  ;;  %vm3442_vm10 = vcmp.eq.f32.partialorder %v1431_v48, 8.507059e+37  ;;  %v1370_v8 = vand.u32 2147483647, %v3392_v21 }
 0x1d6   : > { %v1213_v29 = vpop.f32.mrf.mxu1  ;;  %v1358_v57 = vor.u32 1.1754944e-38, %v1357_v60  ;;  %v1372_v12 = vand.u32 2147483648, %v3392_v21  ;;  %v1434_v24 = vor.u32 1.1754944e-38, %v1433_v59  ;;  %vm1366_vm12 = vweird.f32 %v3392_v21 }
 0x1d7   : > { %v2751_v31 = vpop.eup %2750  ;;  %v2498_v32 = vmul.f32 -1.442695, %v1250_v27  ;;  %v1214_v33 = vadd.f32 %v1213_v29, %v1195_v28  ;;  %v1349_v44 = vmul.f32 %v3389_v10, %v1348_v30  ;;  %vm3503_vm2 = vcmp.eq.f32.partialorder %v1370_v8, 8.507059e+37 }
 0x1d8   : > { %v3398_v34 = vpop.eup %2752  ;;  %v3400_v35 = vadd.f32 1.0, %v2751_v31 }
 0x1d9   : > { %v2755_v37 = vpop.eup %2754  ;;  %v1423_v38 = vmul.f32 %v3398_v34, %v3387_v18  ;;  %2758 = vpow2.f32 %v2498_v32  ;;  %v2495_v39 = vmul.f32 -1.442695, %v1214_v33  ;;  %v1350_v56 = vadd.f32 %v3389_v10, %v1349_v44 }
 0x1da   : > { %v3408_v41 = vpop.eup %2756  ;;  %2760 = vrcp.f32 %v3400_v35  ;;  %v3411_v42 = vadd.f32 1.0, %v2755_v37  ;;  %v1232_v43 = vpop.f32.mrf.mxu2  ;;  %vm1428_vm11 = vweird.f32 %v3398_v34  ;;  %vm1442_vm15 = vweird.f32 %v3400_v35 }
 0x1db   : > { %v1424_v45 = vsub.f32 1.0, %v1423_v38  ;;  %2762 = vpow2.f32 %v2495_v39  ;;  %v1233_v46 = vadd.f32 %v1232_v43, %v3380_v49  ;;  %v1251_v47 = vpop.f32.mrf.mxu3  ;;  %v1362_v50 = vmul.f32 %v3408_v41, %v3392_v21  ;;  %v1263_v51 = vpop.f32.mrf.mxu0  ;;  %vm3472_vm13 = vmor %vm1427_vm9, %vm1428_vm11 }
 0x1dc   : > { %2764 = vrcp.f32 %v3411_v42  ;;  %v1264_v53 = vadd.f32 %v1263_v51, %v3403_v36  ;;  %v1354_v23 = vsel %vm3437_vm8, %v3389_v10, %v1350_v56  ;;  %v1446_v10 = vand.u32 2147483647, %v3400_v35  ;;  %v3511_v56 = vpop.permute.xlu0 %1598 }
 0x1dd   : > { %v1252_v52 = vadd.f32 %v1251_v47, %v1233_v46  ;;  %v1425_v58 = vmul.f32 %v3398_v34, %v1424_v45  ;;  %v1363_v11 = vsub.f32 1.0, %v1362_v50  ;;  %v3484_v38 = vor.u32 1.1754944e-38, %v1372_v12 }
 0x1de   : > { %v1282_v54 = vpop.f32.mrf.mxu1  ;;  %v1359_v40 = vsel %vm3426_vm7, %v1358_v57, %v1354_v23  ;;  %vm1367_vm0 = vweird.f32 %v3408_v41  ;;  %vm3493_vm1 = vcmp.eq.f32.partialorder %v1446_v10, 8.507059e+37  ;;  %v1448_v47 = vand.u32 2147483648, %v3400_v35 }
 0x1df   : > { %v2759_v61 = vpop.eup %2758  ;;  %v2499_v62 = vmul.f32 -1.442695, %v1252_v52  ;;  %v1283_v1 = vadd.f32 %v1282_v54, %v1264_v53  ;;  %v1426_v6 = vadd.f32 %v3398_v34, %v1425_v58  ;;  %v1364_v31 = vmul.f32 %v3408_v41, %v1363_v11  ;;  %vm3541_vm9 = vmor %vm1366_vm12, %vm1367_vm0 }
 0x1e0   : > { %v3446_v4 = vpop.eup %2760  ;;  %v3448_v5 = vadd.f32 1.0, %v2759_v61  ;;  %vm1381_vm3 = vweird.f32 %v3411_v42  ;;  %v1385_v53 = vand.u32 2147483647, %v3411_v42  ;;  %vm1607_vm6 = vcmp.eq.s32.totalorder %v3511_v56, 1 }
 0x1e1   : > { %v2763_v0 = vpop.eup %2762  ;;  %v1438_v7 = vmul.f32 %v3446_v4, %v3400_v35  ;;  %2766 = vpow2.f32 %v2499_v62  ;;  %v1430_v30 = vsel %vm3472_vm13, %v3398_v34, %v1426_v6  ;;  %v1365_v51 = vadd.f32 %v3408_v41, %v1364_v31 }
 0x1e2   : > { %v3456_v19 = vpop.eup %2764  ;;  %2768 = vrcp.f32 %v3448_v5  ;;  %v3459_v20 = vadd.f32 1.0, %v2763_v0  ;;  %v1301_v22 = vpop.f32.mrf.mxu2  ;;  %v1435_v45 = vsel %vm3442_vm10, %v1434_v24, %v1430_v30  ;;  %vm1443_vm4 = vweird.f32 %v3446_v4 }
 0x1e3   : > { %v1377_v25 = vmul.f32 %v3456_v19, %v3411_v42  ;;  %2770 = vtanh.f32 %v1283_v1  ;;  %v1302_v26 = vadd.f32 %v1301_v22, %v3424_v55  ;;  %v1320_v27 = vpop.f32.mrf.mxu3  ;;  %v1265_v29 = vpop.f32.mrf.mxu0  ;;  %v1439_v32 = vsub.f32 1.0, %v1438_v7  ;;  %vm3523_vm5 = vmor %vm1442_vm15, %vm1443_vm4 }
 0x1e4   : > { %2772 = vrcp.f32 %v3459_v20  ;;  %v1266_v18 = vadd.f32 %v1265_v29, %v3403_v36  ;;  %v1562_v59 = vmul.f32 %v1435_v45, %v3276_v13  ;;  %v1449_v6 = vor.u32 1.1754944e-38, %v1448_v47 }
 0x1e5   : > { %v1321_v33 = vadd.f32 %v1320_v27, %v1302_v26  ;;  %v1378_v39 = vsub.f32 1.0, %v1377_v25  ;;  %v1440_v43 = vmul.f32 %v3446_v4, %v1439_v32  ;;  %vm1382_vm7 = vweird.f32 %v3456_v19 }
 0x1e6   : > { %v1284_v37 = vpop.f32.mrf.mxu1  ;;  %vm3529_vm8 = vcmp.eq.f32.partialorder %v1385_v53, 8.507059e+37  ;;  %v1387_v22 = vand.u32 2147483648, %v3411_v42  ;;  %v1369_v10 = vsel %vm3541_vm9, %v3408_v41, %v1365_v51  ;;  %vm3560_vm10 = vmor %vm1381_vm3, %vm1382_vm7  ;;  %v1463_v41 = vand.u32 2147483648, %v3448_v5 }
 0x1e7   : > { %v2767_v34 = vpop.eup %2766  ;;  %v2500_v44 = vmul.f32 -1.442695, %v1321_v33  ;;  %v1285_v60 = vadd.f32 %v1284_v37, %v1266_v18  ;;  %v1441_v57 = vadd.f32 %v3446_v4, %v1440_v43  ;;  %v1379_v1 = vmul.f32 %v3456_v19, %v1378_v39 }
 0x1e8   : > { %v3498_v48 = vpop.eup %2768  ;;  %v3500_v50 = vadd.f32 1.0, %v2767_v34  ;;  %v1374_v43 = vsel %vm3503_vm2, %v3484_v38, %v1369_v10  ;;  %v3577_v34 = vpop.permute.xlu1 %1601  ;;  %vm1457_vm12 = vweird.f32 %v3448_v5 }
 0x1e9   : > { %v2771_v54 = vpop.eup %2770  ;;  %v1453_v49 = vmul.f32 %v3498_v48, %v3448_v5  ;;  %2774 = vpow2.f32 %v2500_v44  ;;  %v1445_v27 = vsel %vm3523_vm5, %v3446_v4, %v1441_v57  ;;  %v1380_v29 = vadd.f32 %v3456_v19, %v1379_v1 }
 0x1ea   : > { %v3515_v58 = vpop.eup %2772  ;;  %2776 = vrcp.f32 %v3500_v50  ;;  %v1566_v61 = vmul.f32 %v2771_v54, %v1359_v40  ;;  %v1303_v62 = vpop.f32.mrf.mxu2  ;;  %v1450_v37 = vsel %vm3493_vm1, %v1449_v6, %v1445_v27  ;;  %vm1458_vm11 = vweird.f32 %v3498_v48 }
 0x1eb   : > { %v1454_v63 = vsub.f32 1.0, %v1453_v49  ;;  %2778 = vtanh.f32 %v1285_v60  ;;  %v1304_v3 = vadd.f32 %v1303_v62, %v3424_v55  ;;  %v1322_v11 = vpop.f32.mrf.mxu3  ;;  %v1268_v7 = vpop.f32.mrf.mxu0  ;;  %v1392_v23 = vmul.f32 %v3515_v58, %v3459_v20  ;;  %vm3590_vm13 = vmor %vm1457_vm12, %vm1458_vm11 }
 0x1ec   : > { %v1570_v0 = vadd.f32 %v1566_v61, %v1562_v59  ;;  %v1269_v35 = vadd.f32 %v1268_v7, %v3403_v36  ;;  %v1388_v44 = vor.u32 1.1754944e-38, %v1387_v22  ;;  %v1384_v46 = vsel %vm3560_vm10, %v3456_v19, %v1380_v29 }
 0x1ed   : > { %v1323_v24 = vadd.f32 %v1322_v11, %v1304_v3  ;;  %v1455_v21 = vmul.f32 %v3498_v48, %v1454_v63  ;;  %v1393_v40 = vsub.f32 1.0, %v1392_v23  ;;  %v1563_v47 = vmul.f32 %v1450_v37, %v3278_v14 }
 0x1ee   : > { %v1287_v25 = vpop.f32.mrf.mxu1  ;;  %v1614_v28 = vsel %vm1606_vm14, %v1570_v0, %v3276_v13  ;;  %v1461_v13 = vand.u32 2147483647, %v3448_v5  ;;  %v1464_v49 = vor.u32 1.1754944e-38, %v1463_v41  ;;  %vm1608_vm0 = vcmp.eq.s32.totalorder %v3577_v34, 1 }
 0x1ef   : > { %v2775_v30 = vpop.eup %2774  ;;  %1622 = vst [vmem:[#allocation14] sm:$0xff] %v1614_v28  ;;  %v2501_v31 = vmul.f32 -1.442695, %v1323_v24  ;;  %v1288_v32 = vadd.f32 %v1287_v25, %v1269_v35  ;;  %v1456_v39 = vadd.f32 %v3498_v48, %v1455_v21  ;;  %v1394_v1 = vmul.f32 %v3515_v58, %v1393_v40 }
 0x1f0   : > { %v3566_v33 = vpop.eup %2776  ;;  %v3568_v18 = vadd.f32 1.0, %v2775_v30  ;;  %vm3597_vm15 = vcmp.eq.f32.partialorder %v1461_v13, 8.507059e+37  ;;  %v1389_v63 = vsel %vm3529_vm8, %v1388_v44, %v1384_v46  ;;  %vm1396_vm1 = vweird.f32 %v3459_v20 }
 0x1f1   : > { %v2779_v42 = vpop.eup %2778  ;;  %2780 = vpow2.f32 %v2501_v31  ;;  %v1468_v60 = vmul.f32 %v3566_v33, %v3500_v50  ;;  %v1460_v19 = vsel %vm3590_vm13, %v3498_v48, %v1456_v39  ;;  %vm1397_vm2 = vweird.f32 %v3515_v58 }
 0x1f2   : > { %2782 = vrcp.f32 %v3568_v18  ;;  %v1306_v45 = vpop.f32.mrf.mxu2  ;;  %v1567_v51 = vmul.f32 %v2779_v42, %v1374_v43  ;;  %v1402_v35 = vand.u32 2147483648, %v3459_v20  ;;  %v1511_v25 = vand.u32 2147483647, %v3568_v18  ;;  %vm3639_vm8 = vmor %vm1396_vm1, %vm1397_vm2 }
 0x1f3   : > { %2784 = vtanh.f32 %v1288_v32  ;;  %v1307_v38 = vadd.f32 %v1306_v45, %v3424_v55  ;;  %v1325_v52 = vpop.f32.mrf.mxu3  ;;  %v1270_v54 = vpop.f32.mrf.mxu0  ;;  %v1469_v48 = vsub.f32 1.0, %v1468_v60  ;;  %v1513_v26 = vand.u32 2147483648, %v3568_v18 }
 0x1f4   : > { %v1571_v57 = vadd.f32 %v1567_v51, %v1563_v47  ;;  %v1271_v61 = vadd.f32 %v1270_v54, %v3403_v36  ;;  %2786 = vtanh.f32 %v1570_v0  ;;  %v1465_v36 = vsel %vm3597_vm15, %v1464_v49, %v1460_v19 }
 0x1f5   : > { %v1326_v59 = vadd.f32 %v1325_v52, %v1307_v38  ;;  %v1400_v0 = vand.u32 2147483647, %v3459_v20  ;;  %v1470_v12 = vmul.f32 %v3566_v33, %v1469_v48  ;;  %v1564_v27 = vmul.f32 %v1465_v36, %v3280_v15 }
 0x1f6   : > { %v1289_v62 = vpop.f32.mrf.mxu1  ;;  %v1615_v11 = vsel %vm1607_vm6, %v1571_v57, %v3278_v14  ;;  %v1395_v14 = vadd.f32 %v3515_v58, %v1394_v1  ;;  %vm1507_vm3 = vweird.f32 %v3568_v18  ;;  %vm1473_vm5 = vweird.f32 %v3566_v33  ;;  %v2806_v1 = vld [vmem:[#allocation13] sm:$0xff] }
 0x1f7   : > { %v2781_v3 = vpop.eup %2780  ;;  %v2502_v6 = vmul.f32 -1.442695, %v1326_v59  ;;  %v1290_v7 = vadd.f32 %v1289_v62, %v1271_v61  ;;  %1623 = vst [vmem:[#allocation14 + $0x8] sm:$0xff] %v1615_v11  ;;  %v1471_v32 = vadd.f32 %v3566_v33, %v1470_v12  ;;  %v1478_v37 = vand.u32 2147483648, %v3500_v50 }
 0x1f8   : > { %v2783_v8 = vpop.eup %2782  ;;  %v3612_v22 = vadd.f32 1.0, %v2781_v3  ;;  %vm3631_vm7 = vcmp.eq.f32.partialorder %v1511_v25, 8.507059e+37  ;;  %vm1472_vm9 = vweird.f32 %v3500_v50  ;;  %v1476_v40 = vand.u32 2147483647, %v3500_v50 }
 0x1f9   : > { %v2785_v23 = vpop.eup %2784  ;;  %v1503_v24 = vmul.f32 %v2783_v8, %v3568_v18  ;;  %2788 = vpow2.f32 %v2502_v6  ;;  %vm1508_vm4 = vweird.f32 %v2783_v8  ;;  %v1399_v20 = vsel %vm3639_vm8, %v3515_v58, %v1395_v14  ;;  %vm3654_vm10 = vmor %vm1472_vm9, %vm1473_vm5  ;;  %v3667_v18 = vpop.permute.xlu1 %1604 }
 0x1fa   : > { %2790 = vrcp.f32 %v3612_v22  ;;  %v1308_v28 = vpop.f32.mrf.mxu2  ;;  %v1568_v29 = vmul.f32 %v2785_v23, %v1389_v63  ;;  %v2787_v30 = vpop.eup %2786  ;;  %vm1509_vm11 = vmor %vm1507_vm3, %vm1508_vm4  ;;  %v1475_v51 = vsel %vm3654_vm10, %v3566_v33, %v1471_v32  ;;  %v1479_v53 = vor.u32 1.1754944e-38, %v1478_v37 }
 0x1fb   : > { %v1504_v10 = vsub.f32 1.0, %v1503_v24  ;;  %2792 = vtanh.f32 %v1290_v7  ;;  %v1309_v21 = vadd.f32 %v1308_v28, %v3424_v55  ;;  %v1327_v31 = vpop.f32.mrf.mxu3  ;;  %v1514_v55 = vor.u32 1.1754944e-38, %v1513_v26 }
 0x1fc   : > { %v3628_v13 = vadd.f32 %v1568_v29, %v1564_v27  ;;  %2794 = vtanh.f32 %v1571_v57  ;;  %vm1401_vm12 = vcmp.eq.f32.partialorder %v1400_v0, 8.507059e+37  ;;  %vm1477_vm13 = vcmp.eq.f32.partialorder %v1476_v40, 8.507059e+37 }
 0x1fd   : > { %v1505_v4 = vmul.f32 %v2783_v8, %v1504_v10  ;;  %v1328_v41 = vadd.f32 %v1327_v31, %v1309_v21  ;;  %v1480_v57 = vsel %vm1477_vm13, %v1479_v53, %v1475_v51  ;;  %v1526_v33 = vand.u32 2147483647, %v3612_v22 }
 0x1fe   : > { %v1616_v60 = vsel %vm1608_vm0, %v3628_v13, %v3280_v15  ;;  %v1403_v15 = vor.u32 1.1754944e-38, %v1402_v35  ;;  %v1528_v59 = vand.u32 2147483648, %v3612_v22  ;;  %v1565_v61 = vmul.f32 %v1480_v57, %v3282_v16 }
 0x1ff   : > { %v2789_v43 = vpop.eup %2788  ;;  %v1506_v44 = vadd.f32 %v2783_v8, %v1505_v4  ;;  %v2503_v45 = vmul.f32 -1.442695, %v1328_v41  ;;  %1624 = vst [vmem:[#allocation14 + $0x10] sm:$0xff] %v1616_v60  ;;  %vm1609_vm1 = vcmp.eq.s32.totalorder %v3667_v18, 1  ;;  %vm1522_vm2 = vweird.f32 %v3612_v22 }
 0x200   : > { %v2791_v47 = vpop.eup %2790  ;;  %v1500_v50 = vadd.f32 1.0, %v2789_v43  ;;  %v1404_v49 = vsel %vm1401_vm12, %v1403_v15, %v1399_v20 }
 0x201   : > { %v2793_v58 = vpop.eup %2792  ;;  %v1510_v38 = vsel %vm1509_vm11, %v2783_v8, %v1506_v44  ;;  %v1518_v52 = vmul.f32 %v2791_v47, %v3612_v22  ;;  %2796 = vpow2.f32 %v2503_v45  ;;  %vm1523_vm15 = vweird.f32 %v2791_v47  ;;  %v2807_v22 = vld [vmem:[#allocation13 + $0x8] sm:$0xff] }
 0x202   : > { %v1515_v54 = vsel %vm3631_vm7, %v1514_v55, %v1510_v38  ;;  %2798 = vrcp.f32 %v1500_v50  ;;  %v1569_v62 = vmul.f32 %v2793_v58, %v1404_v49  ;;  %v2795_v3 = vpop.eup %2794  ;;  %vm1524_vm3 = vmor %vm1522_vm2, %vm1523_vm15  ;;  %v1529_v8 = vor.u32 1.1754944e-38, %v1528_v59 }
 0x203   : > { %v1578_v19 = vmul.f32 %v2787_v30, %v1515_v54  ;;  %v1519_v5 = vsub.f32 1.0, %v1518_v52  ;;  %v1543_v25 = vand.u32 2147483648, %v1500_v50  ;;  %v1541_v28 = vand.u32 2147483647, %v1500_v50 }
 0x204   : > { %v1573_v11 = vadd.f32 %v1569_v62, %v1565_v61  ;;  %vm1537_vm5 = vweird.f32 %v1500_v50 }
 0x205   : > { %v1610_v63 = vsel %vm1606_vm14, %v1578_v19, %v2806_v1  ;;  %v1520_v48 = vmul.f32 %v2791_v47, %v1519_v5  ;;  %vm1527_vm14 = vcmp.eq.f32.partialorder %v1526_v33, 8.507059e+37  ;;  %v1544_v29 = vor.u32 1.1754944e-38, %v1543_v25 }
 0x206   : > { %1618 = vst [vmem:[#allocation13] sm:$0xff] %v1610_v63  ;;  %v1617_v2 = vsel %vm1609_vm1, %v1573_v11, %v3282_v16  ;;  %vm1542_vm8 = vcmp.eq.f32.partialorder %v1541_v28, 8.507059e+37 }
 0x207   : > { %v2797_v6 = vpop.eup %2796  ;;  %v1521_v7 = vadd.f32 %v2791_v47, %v1520_v48  ;;  %1625 = vst [vmem:[#allocation14 + $0x18] sm:$0xff] %v1617_v2 }
 0x208   : > { %v2799_v36 = vpop.eup %2798  ;;  %v1501_v0 = vadd.f32 1.0, %v2797_v6 }
 0x209   : > { %v1525_v12 = vsel %vm1524_vm3, %v2791_v47, %v1521_v7  ;;  %v1533_v23 = vmul.f32 %v2799_v36, %v1500_v50  ;;  %vm1538_vm4 = vweird.f32 %v2799_v36 }
 0x20a   : > { %v1530_v24 = vsel %vm1527_vm14, %v1529_v8, %v1525_v12  ;;  %2800 = vrcp.f32 %v1501_v0  ;;  %vm1539_vm7 = vmor %vm1537_vm5, %vm1538_vm4  ;;  %v1558_v41 = vand.u32 2147483648, %v1501_v0  ;;  %v1556_v39 = vand.u32 2147483647, %v1501_v0 }
 0x20b   : > { %v1579_v14 = vmul.f32 %v2795_v3, %v1530_v24  ;;  %v1534_v35 = vsub.f32 1.0, %v1533_v23  ;;  %2802 = vtanh.f32 %v3628_v13  ;;  %vm1552_vm9 = vweird.f32 %v1501_v0 }
 0x20c   : > { %2804 = vtanh.f32 %v1573_v11  ;;  %v1559_v42 = vor.u32 1.1754944e-38, %v1558_v41  ;;  %vm1557_vm11 = vcmp.eq.f32.partialorder %v1556_v39, 8.507059e+37 }
 0x20d   : > { %v1611_v26 = vsel %vm1607_vm6, %v1579_v14, %v2807_v22  ;;  %v1535_v27 = vmul.f32 %v2799_v36, %v1534_v35 }
 0x20e   : > { %1619 = vst [vmem:[#allocation13 + $0x8] sm:$0xff] %v1611_v26 }
 0x20f   : > { %v1536_v16 = vadd.f32 %v2799_v36, %v1535_v27 }
 0x210   : > { %v2801_v10 = vpop.eup %2800 }
 0x211   : > { %v1540_v21 = vsel %vm1539_vm7, %v2799_v36, %v1536_v16  ;;  %v1548_v30 = vmul.f32 %v2801_v10, %v1501_v0  ;;  %v2803_v31 = vpop.eup %2802  ;;  %vm1553_vm6 = vweird.f32 %v2801_v10 }
 0x212   : > { %v1545_v32 = vsel %vm1542_vm8, %v1544_v29, %v1540_v21  ;;  %vm1554_vm10 = vmor %vm1552_vm9, %vm1553_vm6  ;;  %v2805_v43 = vpop.eup %2804 }
 0x213   : > { %v1580_v4 = vmul.f32 %v2803_v31, %v1545_v32  ;;  %v1549_v13 = vsub.f32 1.0, %v1548_v30 }
 0x215   : > { %v1612_v56 = vsel %vm1608_vm0, %v1580_v4, %v3337_v17  ;;  %v1550_v37 = vmul.f32 %v2801_v10, %v1549_v13 }
 0x216   : > { %1620 = vst [vmem:[#allocation13 + $0x10] sm:$0xff] %v1612_v56 }
 0x217   : > { %v1551_v55 = vadd.f32 %v2801_v10, %v1550_v37 }
 0x219   : > { %v1555_v40 = vsel %vm1554_vm10, %v2801_v10, %v1551_v55 }
 0x21a   : > { %v1560_v44 = vsel %vm1557_vm11, %v1559_v42, %v1555_v40  ;;  %1631 = sbr.rel (%p2505_p4) target bundleno = 551 (0x227), region = 80 }
 0x21b   : > { %v1581_v60 = vmul.f32 %v2805_v43, %v1560_v44 }
 0x21d   : > { %v1613_v45 = vsel %vm1609_vm1, %v1581_v60, %v3339_v9 }
 0x21e   : > { %1621 = vst [vmem:[#allocation13 + $0x18] sm:$0xff] %v1613_v45 }
 0x225   : > { %v1633_v17 = vld [vmem:[%s1632_s20] sm:$0x1] }
 0x226   : > { %1634 = vst [vmem:[#allocation2] sm:$0x1] %v1633_v17 }
 0x227 PF: > { %s1635_s23 = sadd.s32 1, %s3368_s11 }
 0x228   : > { %s1636_s13 = sld [smem:[#allocation7 + %s1635_s23]] }
 0x22e   : > { %p2506_p5 = scmp.lt.s32.totalorder %s1636_s13, 0 }
 0x22f   : > { %s1641_s24 = scalar_lea.vmem (!%p2506_p5), [#allocation13], %s1636_s13 }
 0x230   : > { %1640 = sbr.rel (%p2506_p5) target bundleno = 567 (0x237), region = 84 }
 0x235   : > { %v1642_v34 = vld [vmem:[%s1641_s24] sm:$0x1] }
 0x236   : > { %1643 = vst [vmem:[#allocation2 + $0x1] sm:$0x1] %v1642_v34 }
 0x237 PF: > { %s1644_s29 = sadd.s32 2, %s3368_s11 }
 0x238   : > { %s1645_s26 = sld [smem:[#allocation7 + %s1644_s29]] }
 0x23e   : > { %p2507_p13 = scmp.lt.s32.totalorder %s1645_s26, 0 }
 0x23f   : > { %s1650_s27 = scalar_lea.vmem (!%p2507_p13), [#allocation13], %s1645_s26 }
 0x240   : > { %1649 = sbr.rel (%p2507_p13) target bundleno = 583 (0x247), region = 88 }
 0x245   : > { %v1651_v9 = vld [vmem:[%s1650_s27] sm:$0x1] }
 0x246   : > { %1652 = vst [vmem:[#allocation2 + $0x2] sm:$0x1] %v1651_v9 }
 0x247 PF: > { %s1653_s14 = sadd.s32 3, %s3368_s11 }
 0x248   : > { %s1654_s21 = sld [smem:[#allocation7 + %s1653_s14]] }
 0x24e   : > { %p2508_p0 = scmp.lt.s32.totalorder %s1654_s21, 0 }
 0x24f   : > { %s1659_s22 = scalar_lea.vmem (!%p2508_p0), [#allocation13], %s1654_s21 }
 0x250   : > { %1658 = sbr.rel (%p2508_p0) target bundleno = 599 (0x257), region = 92 }
 0x255   : > { %v1660_v20 = vld [vmem:[%s1659_s22] sm:$0x1] }
 0x256   : > { %1661 = vst [vmem:[#allocation2 + $0x3] sm:$0x1] %v1660_v20 }
 0x257 PF: > { %s1662_s25 = sadd.s32 4, %s3368_s11 }
 0x258   : > { %s1663_s17 = sld [smem:[#allocation7 + %s1662_s25]] }
 0x25e   : > { %p2509_p2 = scmp.lt.s32.totalorder %s1663_s17, 0 }
 0x25f   : > { %s1668_s18 = scalar_lea.vmem (!%p2509_p2), [#allocation13], %s1663_s17 }
 0x260   : > { %1667 = sbr.rel (%p2509_p2) target bundleno = 615 (0x267), region = 96 }
 0x265   : > { %v1669_v46 = vld [vmem:[%s1668_s18] sm:$0x1] }
 0x266   : > { %1670 = vst [vmem:[#allocation2 + $0x4] sm:$0x1] %v1669_v46 }
 0x267 PF: > { %s1671_s0 = sadd.s32 5, %s3368_s11 }
 0x268   : > { %s1672_s28 = sld [smem:[#allocation7 + %s1671_s0]] }
 0x26e   : > { %p2510_p3 = scmp.lt.s32.totalorder %s1672_s28, 0 }
 0x26f   : > { %s1677_s16 = scalar_lea.vmem (!%p2510_p3), [#allocation13], %s1672_s28 }
 0x270   : > { %1676 = sbr.rel (%p2510_p3) target bundleno = 631 (0x277), region = 100 }
 0x275   : > { %v1678_v47 = vld [vmem:[%s1677_s16] sm:$0x1] }
 0x276   : > { %1679 = vst [vmem:[#allocation2 + $0x5] sm:$0x1] %v1678_v47 }
 0x277 PF: > { %s1680_s19 = sadd.s32 6, %s3368_s11 }
 0x278   : > { %s1681_s20 = sld [smem:[#allocation7 + %s1680_s19]] }
 0x27e   : > { %p2511_p7 = scmp.lt.s32.totalorder %s1681_s20, 0 }
 0x27f   : > { %s1686_s23 = scalar_lea.vmem (!%p2511_p7), [#allocation13], %s1681_s20 }
 0x280   : > { %1685 = sbr.rel (%p2511_p7) target bundleno = 647 (0x287), region = 104 }
 0x285   : > { %v1687_v50 = vld [vmem:[%s1686_s23] sm:$0x1] }
 0x286   : > { %1688 = vst [vmem:[#allocation2 + $0x6] sm:$0x1] %v1687_v50 }
 0x287 PF: > { %s1689_s13 = sadd.s32 7, %s3368_s11 }
 0x288   : > { %s1690_s24 = sld [smem:[#allocation7 + %s1689_s13]] }
 0x28e   : > { %p2512_p8 = scmp.lt.s32.totalorder %s1690_s24, 0 }
 0x28f   : > { %s1695_s29 = scalar_lea.vmem (!%p2512_p8), [#allocation13], %s1690_s24 }
 0x290   : > { %1694 = sbr.rel (%p2512_p8) target bundleno = 663 (0x297), region = 108 }
 0x295   : > { %v1696_v15 = vld [vmem:[%s1695_s29] sm:$0x1] }
 0x296   : > { %1697 = vst [vmem:[#allocation2 + $0x7] sm:$0x1] %v1696_v15 }
 0x297 PF: > { %p2513_p9 = scmp.ne.s32.totalorder %s3165_s2, 3 }
 0x299   : > { %1701 = sbr.rel (%p2513_p9) target bundleno = 1253 (0x4e5), region = 112 }
 0x29e   : > { %v1704_v51 = vld [vmem:[#allocation13 + $0x10] sm:$0xff]  ;;  %v1705_v58 = vld [vmem:[#allocation13 + $0x18] sm:$0xff]  ;;  %v1702_v38 = vld [vmem:[#allocation13] sm:$0xff]  ;;  %vm1764_vm0 = vcmask 261120   ;;  %vm1957_vm12 = vcmask 1041409   ;;  %vm1959_vm13 = vcmask 1042434  }
 0x29f   : > { %v1707_v52 = vpack.c.bf16 %v1705_v58, %v1704_v51  ;;  %v1703_v53 = vld [vmem:[#allocation13 + $0x8] sm:$0xff]  ;;  %v2640_v18 = vld [vmem:[%s3805_s8] sm:$0xff]  ;;  %v2641_v57 = vld [vmem:[%s3805_s8 + $0x8] sm:$0xff]  ;;  %vm1961_vm15 = vcmask 1043459   ;;  %vm1963_vm1 = vcmask 1044484   ;;  %vm1965_vm2 = vcmask 1045509  }
 0x2a0   : > { %v1706_v54 = vpack.c.bf16 %v1703_v53, %v1702_v38  ;;  %v2642_v19 = vld [vmem:[%s3805_s8 + $0x10] sm:$0xff]  ;;  %v2644_v5 = vld [vmem:[%s3805_s8 + $0x20] sm:$0xff]  ;;  %v2643_v33 = vld [vmem:[%s3805_s8 + $0x18] sm:$0xff]  ;;  %vm1967_vm3 = vcmask 1046534   ;;  %vm1934_vm14 = vcmask 130112   ;;  %vm1969_vm4 = vcmask 1047559  }
 0x2a1   : > { %1795 = vmatpush.bf16.msra.mxu0 %v1707_v52  ;;  %2648 = vmatpush.bf16.msra.mxu1 %v1707_v52  ;;  %v2646_v49 = vld [vmem:[%s3805_s8 + $0x30] sm:$0xff]  ;;  %v2645_v59 = vld [vmem:[%s3805_s8 + $0x28] sm:$0xff]  ;;  %v2647_v61 = vld [vmem:[%s3805_s8 + $0x38] sm:$0xff]  ;;  %vm1973_vm7 = vcmask 130048   ;;  %vm2004_vm8 = vcmask 7168   ;;  %vm2012_vm6 = vcmask 0  }
 0x2a2   : > { %2649 = vmatpush.bf16.msra.mxu2 %v1707_v52  ;;  %2650 = vmatpush.bf16.msra.mxu3 %v1707_v52  ;;  %v1838_v62 = vld [vmem:[#allocation2] sm:$0xff] }
 0x2a3   : > { %v1841_v1 = vrot.slane %v1838_v62, 2  ;;  %v1847_v48 = vperm.slane %v1838_v62, 0  ;;  %v1843_v6 = vrot.slane %v1838_v62, 4  ;;  %v1845_v7 = vrot.slane %v1838_v62, 6 }
 0x2a4   : > { %v1840_v25 = vrot.slane %v1838_v62, 1  ;;  %v1844_v10 = vrot.slane %v1838_v62, 5  ;;  %v1842_v4 = vrot.slane %v1838_v62, 3  ;;  %v1846_v55 = vrot.slane %v1838_v62, 7 }
 0x2a5   : > { %1796 = vmatpush.bf16.msra.mxu0 %v1706_v54  ;;  %2651 = vmatpush.bf16.msra.mxu1 %v1706_v54  ;;  %v1849_v63 = vperm.slane %v1841_v1, 0  ;;  %v1851_v0 = vperm.slane %v1843_v6, 0  ;;  %v1853_v2 = vperm.slane %v1845_v7, 0 }
 0x2a6   : > { %2652 = vmatpush.bf16.msra.mxu2 %v1706_v54  ;;  %2653 = vmatpush.bf16.msra.mxu3 %v1706_v54  ;;  %v1848_v26 = vperm.slane %v1840_v25, 0  ;;  %v1852_v31 = vperm.slane %v1844_v10, 0  ;;  %v1850_v37 = vperm.slane %v1842_v4, 0  ;;  %v1854_v45 = vperm.slane %v1846_v55, 0 }
 0x2a8   : > { %2546 = vmatmul.msk.bf16.vlgmr.msra.gmra.mxu0 %vm1764_vm0, %v2640_v18  ;;  %2548 = vmatmul.msk.bf16.vlgmr.msra.gmra.mxu1 %vm1764_vm0, %v2642_v19 }
 0x2a9   : > { %2550 = vmatmul.msk.bf16.vlgmr.msra.gmra.mxu2 %vm1764_vm0, %v2644_v5  ;;  %2552 = vmatmul.msk.bf16.vlgmr.msra.gmra.mxu3 %vm1764_vm0, %v2646_v49 }
 0x2b8   : > { %2547 = vmatmul.msk.bf16.gmra.mxu0 %vm1764_vm0, %v2641_v57  ;;  %2549 = vmatmul.msk.bf16.gmra.mxu1 %vm1764_vm0, %v2643_v33  ;;  %v1929_v33 = vlaneseq }
 0x2b9   : > { %2551 = vmatmul.msk.bf16.gmra.mxu2 %vm1764_vm0, %v2645_v59  ;;  %2553 = vmatmul.msk.bf16.gmra.mxu3 %vm1764_vm0, %v2647_v61 }
 0x2ba   : > { %v1930_v59 = vand.u32 127, %v1929_v33 }
 0x2bc   : > { %v1932_v1 = vadd.s32 4294967288, %v1930_v59 }
 0x325   : > { %v1798_v3 = vpop.f32.mrf.mxu0  ;;  %v1808_v11 = vpop.f32.mrf.mxu1 }
 0x326   : > { %v1867_v36 = vmul.f32 %v1849_v63, %v1808_v11  ;;  %v1863_v8 = vmul.f32 %v1847_v48, %v1798_v3 }
 0x328   : > { %1887 = vadd.xlane.f32.xlu2 %v1867_v36  ;;  %1879 = vadd.xlane.f32.xlu0 %v1863_v8 }
 0x32c   : > { %v1818_v12 = vpop.f32.mrf.mxu2  ;;  %v1828_v23 = vpop.f32.mrf.mxu3 }
 0x32d   : > { %v1871_v24 = vmul.f32 %v1851_v0, %v1818_v12  ;;  %v1800_v14 = vpop.f32.mrf.mxu0  ;;  %v1875_v35 = vmul.f32 %v1853_v2, %v1828_v23  ;;  %v1810_v22 = vpop.f32.mrf.mxu1 }
 0x32e   : > { %v1868_v28 = vmul.f32 %v1849_v63, %v1810_v22  ;;  %v1864_v29 = vmul.f32 %v1847_v48, %v1800_v14 }
 0x330   : > { %1895 = vadd.xlane.f32.xlu2 %v1871_v24  ;;  %1903 = vadd.xlane.f32.xlu0 %v1875_v35 }
 0x334   : > { %v1820_v27 = vpop.f32.mrf.mxu2  ;;  %v1830_v30 = vpop.f32.mrf.mxu3 }
 0x335   : > { %v1803_v16 = vpop.f32.mrf.mxu0  ;;  %v1872_v41 = vmul.f32 %v1851_v0, %v1820_v27  ;;  %v1813_v39 = vpop.f32.mrf.mxu1  ;;  %v1876_v47 = vmul.f32 %v1853_v2, %v1830_v30 }
 0x336   : > { %v1865_v21 = vmul.f32 %v1848_v26, %v1803_v16  ;;  %v1869_v40 = vmul.f32 %v1850_v37, %v1813_v39 }
 0x338   : > { %1889 = vadd.xlane.f32.xlu2 %v1868_v28  ;;  %1881 = vadd.xlane.f32.xlu0 %v1864_v29 }
 0x339   : > { %1883 = vadd.xlane.f32.xlu1 %v1865_v21 }
 0x33c   : > { %v1823_v32 = vpop.f32.mrf.mxu2  ;;  %v1833_v56 = vpop.f32.mrf.mxu3 }
 0x33d   : > { %v1873_v13 = vmul.f32 %v1852_v31, %v1823_v32  ;;  %v1805_v42 = vpop.f32.mrf.mxu0  ;;  %v1877_v34 = vmul.f32 %v1854_v45, %v1833_v56  ;;  %v1815_v9 = vpop.f32.mrf.mxu1 }
 0x33e   : > { %v1866_v60 = vmul.f32 %v1848_v26, %v1805_v42  ;;  %v1870_v46 = vmul.f32 %v1850_v37, %v1815_v9 }
 0x340   : > { %1897 = vadd.xlane.f32.xlu0 %v1872_v41 }
 0x341   : > { %1899 = vadd.xlane.f32.xlu1 %v1873_v13 }
 0x344   : > { %v1825_v43 = vpop.f32.mrf.mxu2  ;;  %v1835_v17 = vpop.f32.mrf.mxu3 }
 0x345   : > { %v1874_v44 = vmul.f32 %v1852_v31, %v1825_v43  ;;  %v1878_v20 = vmul.f32 %v1854_v45, %v1835_v17 }
 0x347   : > { %1901 = vadd.xlane.f32.xlu2 %v1874_v44  ;;  %v1911_v44 = vld [vmem:[%s3806_s9] sm:$0xff] }
 0x348   : > { %1891 = vadd.xlane.f32.xlu0 %v1869_v40  ;;  %vm1912_vm5 = vcmp.gt.f32.partialorder %v1911_v44, 0.0 }
 0x349   : > { %1885 = vadd.xlane.f32.xlu1 %v1866_v60 }
 0x34f   : > { %1907 = vadd.xlane.f32.xlu2 %v1877_v34 }
 0x350   : > { %1909 = vadd.xlane.f32.xlu0 %v1878_v20 }
 0x351   : > { %1893 = vadd.xlane.f32.xlu1 %v1870_v46 }
 0x359   : > { %1905 = vadd.xlane.f32.xlu1 %v1876_v47 }
 0x39b   : > { %v1880_v50 = vpop.xlane.xlu0 %1879  ;;  %v1888_v15 = vpop.xlane.xlu2 %1887 }
 0x39c   : > { %v1988_v52 = vrot.slane %v1888_v15, 6  ;;  %v1931_v24 = vperm.slane %v1880_v50, %v1930_v59  ;;  %v1939_v25 = vperm.slane %v1888_v15, %v1930_v59 }
 0x3a3   : > { %v3730_v51 = vpop.xlane.xlu0 %1903  ;;  %v1896_v58 = vpop.xlane.xlu2 %1895 }
 0x3a4   : > { %v1992_v3 = vrot.slane %v1896_v58, 4  ;;  %v1996_v36 = vrot.slane %v3730_v51, 2  ;;  %v1945_v13 = vperm.slane %v1896_v58, %v1930_v59  ;;  %v1951_v45 = vperm.slane %v3730_v51, %v1930_v59 }
 0x3ab   : > { %v1882_v38 = vpop.xlane.xlu0 %1881  ;;  %v1890_v5 = vpop.xlane.xlu2 %1889 }
 0x3ac   : > { %v1884_v53 = vpop.xlane.xlu1 %1883  ;;  %v1933_v0 = vperm.slane %v1882_v38, %v1932_v1  ;;  %v1940_v22 = vperm.slane %v1890_v5, %v1932_v1 }
 0x3ad   : > { %v1986_v54 = vrot.slane %v1884_v53, 7  ;;  %v1936_v2 = vperm.slane %v1884_v53, %v1930_v59 }
 0x3ae   : > { %v1935_v27 = vsel %vm1934_vm14, %v1933_v0, %v1931_v24  ;;  %v1941_v30 = vsel %vm1934_vm14, %v1940_v22, %v1939_v25 }
 0x3af   : > { %v1987_v18 = vsel %vm1957_vm12, %v1986_v54, %v1880_v50 }
 0x3b0   : > { %v1989_v19 = vsel %vm1959_vm13, %v1988_v52, %v1987_v18 }
 0x3b3   : > { %v1898_v49 = vpop.xlane.xlu0 %1897 }
 0x3b4   : > { %v1900_v57 = vpop.xlane.xlu1 %1899  ;;  %v1946_v31 = vperm.slane %v1898_v49, %v1932_v1 }
 0x3b5   : > { %v1994_v11 = vrot.slane %v1900_v57, 3  ;;  %v1948_v55 = vperm.slane %v1900_v57, %v1930_v59  ;;  %v2002_v57 = vld [vmem:[%s3807_s10] sm:$0xff] }
 0x3b6   : > { %v1947_v39 = vsel %vm1934_vm14, %v1946_v31, %v1945_v13 }
 0x3ba   : > { %v1902_v61 = vpop.xlane.xlu2 %1901 }
 0x3bb   : > { %v1892_v62 = vpop.xlane.xlu0 %1891  ;;  %v1949_v37 = vperm.slane %v1902_v61, %v1932_v1 }
 0x3bc   : > { %v1990_v63 = vrot.slane %v1892_v62, 5  ;;  %v1886_v48 = vpop.xlane.xlu1 %1885  ;;  %v1942_v16 = vperm.slane %v1892_v62, %v1930_v59 }
 0x3bd   : > { %v1937_v7 = vperm.slane %v1886_v48, %v1932_v1  ;;  %v1950_v34 = vsel %vm1934_vm14, %v1949_v37, %v1948_v55 }
 0x3be   : > { %v1991_v6 = vsel %vm1961_vm15, %v1990_v63, %v1989_v19 }
 0x3bf   : > { %v1993_v8 = vsel %vm1963_vm1, %v1992_v3, %v1991_v6  ;;  %v1938_v14 = vsel %vm1934_vm14, %v1937_v7, %v1936_v2 }
 0x3c0   : > { %v1995_v12 = vsel %vm1965_vm2, %v1994_v11, %v1993_v8  ;;  %v1958_v10 = vsel %vm1957_vm12, %v1938_v14, %v1935_v27 }
 0x3c1   : > { %v1997_v23 = vsel %vm1967_vm3, %v1996_v36, %v1995_v12  ;;  %v1960_v4 = vsel %vm1959_vm13, %v1941_v30, %v1958_v10 }
 0x3c2   : > { %v1908_v35 = vpop.xlane.xlu2 %1907 }
 0x3c3   : > { %v1998_v26 = vrot.slane %v1908_v35, 1  ;;  %v1910_v56 = vpop.xlane.xlu0 %1909  ;;  %v1954_v42 = vperm.slane %v1908_v35, %v1930_v59 }
 0x3c4   : > { %v1894_v28 = vpop.xlane.xlu1 %1893  ;;  %v1955_v40 = vperm.slane %v1910_v56, %v1932_v1 }
 0x3c5   : > { %v1943_v29 = vperm.slane %v1894_v28, %v1932_v1  ;;  %v1999_v21 = vsel %vm1969_vm4, %v1998_v26, %v1997_v23 }
 0x3c6   : > { %v1956_v46 = vsel %vm1934_vm14, %v1955_v40, %v1954_v42 }
 0x3c7   : > { %v1944_v32 = vsel %vm1934_vm14, %v1943_v29, %v1942_v16 }
 0x3c8   : > { %v1962_v41 = vsel %vm1961_vm15, %v1944_v32, %v1960_v4 }
 0x3c9   : > { %v1964_v60 = vsel %vm1963_vm1, %v1947_v39, %v1962_v41 }
 0x3ca   : > { %v1966_v20 = vsel %vm1965_vm2, %v1950_v34, %v1964_v60 }
 0x3cc   : > { %v1906_v43 = vpop.xlane.xlu1 %1905 }
 0x3cd   : > { %v1952_v17 = vperm.slane %v1906_v43, %v1932_v1 }
 0x3cf   : > { %v1953_v9 = vsel %vm1934_vm14, %v1952_v17, %v1951_v45 }
 0x3d0   : > { %v1968_v47 = vsel %vm1967_vm3, %v1953_v9, %v1966_v20 }
 0x3d1   : > { %v1970_v50 = vsel %vm1969_vm4, %v1956_v46, %v1968_v47 }
 0x3d2   : > { %v1972_v15 = vsel %vm1912_vm5, %v1970_v50, -1e+30 }
 0x3d3   : > { %v1974_v58 = vsel %vm1973_vm7, %v1972_v15, -inf }
 0x3d4   : > { %1975 = vmax.xlane.f32.xlu1 %v1974_v58 }
 0x447   : > { %v1976_v38 = vpop.xlane.xlu1 %1975 }
 0x448   : > { %v1977_v51 = vsub.f32 %v1972_v15, %v1976_v38 }
 0x44a   : > { %v1978_v52 = vmul.f32 1.442695, %v1977_v51 }
 0x44c   : > { %2808 = vpow2.f32 %v1978_v52 }
 0x452   : > { %v2809_v53 = vpop.eup %2808 }
 0x453   : > { %v1980_v54 = vsel %vm1973_vm7, %v2809_v53, 0.0 }
 0x454   : > { %1981 = vadd.xlane.f32.xlu2 %v1980_v54 }
 0x4c7   : > { %v1982_v18 = vpop.xlane.xlu2 %1981 }
 0x4c8   : > { %2810 = vlog2.f32 %v1982_v18 }
 0x4ce   : > { %v2811_v19 = vpop.eup %2810 }
 0x4cf   : > { %v1984_v5 = vmul.f32 0.6931472, %v2811_v19 }
 0x4d1   : > { %v1985_v49 = vadd.f32 %v1984_v5, %v1976_v38 }
 0x4d3   : > { %v2001_v33 = vsub.f32 %v1985_v49, %v1999_v21 }
 0x4d5   : > { %v2003_v59 = vmul.f32 %v2002_v57, %v2001_v33 }
 0x4d7   : > { %v2005_v61 = vsel %vm2004_vm8, %v2003_v59, 0.0 }
 0x4d8   : > { %v2006_v62 = vrot.slane %v2005_v61, 4 }
 0x4da   : > { %v2007_v1 = vadd.f32 %v2006_v62, %v2005_v61 }
 0x4dc   : > { %v2008_v63 = vrot.slane %v2007_v1, 2 }
 0x4de   : > { %v2009_v48 = vadd.f32 %v2008_v63, %v2007_v1 }
 0x4e0   : > { %v2010_v3 = vrot.slane %v2009_v48, 1 }
 0x4e2   : > { %v2011_v11 = vadd.f32 %v2010_v3, %v2009_v48 }
 0x4e4   : > { %2013 = vst.msk [vmem:[#allocation16] sm:$0x1] %vm2012_vm6, %v2011_v11 }
 0x4e5 PF: > { %p2687_p10 = scmp.eq.s32.totalorder %s3165_s2, 3  ;;  %s3052_s27 = smov [#allocation14]  }
 0x4e6   : > { %s2033_s14 = sshll.u32 %s3052_s27, 4  ;;  %s3856_s25 = sld [smem:[#allocation27_spill]]  ;;  %s2034_s14 = int_to_ptr.vmem [resolvable:$true] %s2033_s14 }
 0x4e7   : > { %s3053_s18 = smov 128   ;;  %s3054_s0 = smov 8  }
 0x4e8   : > { %s3857_s19 = sld [smem:[#allocation26_spill]]  ;;  %s3055_s23 = smov [#allocation13]  }
 0x4e9   : > { %s2019_s13 = sshll.u32 %s3055_s23, 4  ;;  %s3056_s24 = smov [#allocation16]   ;;  %s2020_s13 = int_to_ptr.vmem [resolvable:$true] %s2019_s13 }
 0x4ea   : > { %s2048_s29 = sshll.u32 %s3056_s24, 4  ;;  %s3858_s27 = sld [smem:[#allocation28_spill]]  ;;  %s2049_s29 = int_to_ptr.vmem [resolvable:$true] %s2048_s29 }
 0x4ec   : > { %s2035_s17 = sshll.u32 %s3856_s25, 4  ;;  %s2036_s17 = int_to_ptr.hbm [resolvable:$true] %s2035_s17 }
 0x4ed   : > { %2665 = dma.vmem_to_hbm [thread:$0]  (%p2687_p10), %s2034_s14, 512, %s2036_s17, [#allocation15], %s3053_s18, %s3053_s18, %s3054_s0  }
 0x4ee   : > { %s2021_s20 = sshll.u32 %s3857_s19, 4  ;;  %s2022_s20 = int_to_ptr.hbm [resolvable:$true] %s2021_s20 }
 0x4ef   : > { %2663 = dma.vmem_to_hbm [thread:$0]  (%p2687_p10), %s2020_s13, 512, %s2022_s20, [#allocation10], %s3053_s18, %s3053_s18, %s3054_s0  }
 0x4f0   : > { %s2050_s21 = sshll.u32 %s3858_s27, 4  ;;  %s2051_s21 = int_to_ptr.hbm [resolvable:$true] %s2050_s21 }
 0x4f1   : > { %2667 = dma.vmem_to_hbm [thread:$0]  (%p2687_p10), %s2049_s29, 16, %s2051_s21, [#allocation15]  }
 0x4f2   : > { %3019 = dma.done.wait (%p2687_p10), [#allocation10], 512  }
 0x4f3   : > { %3021 = vsyncadd (%p2687_p10), [#allocation10], 4294966784 }
 0x4f4   : > { %3023 = dma.done.wait (%p2687_p10), [#allocation15], 528  }
 0x4f5   : > { %3025 = vsyncadd (%p2687_p10), [#allocation15], 4294966768 }
 0x4f6 PF: > { %s3859_s16 = sld [smem:[#allocation24_spill]]  ;;  %s3860_s0 = smov %s3032_s1 }
 0x4f7   : > { %s3861_s1 = smov %s3036_s30  ;;  %s3862_s30 = smov %s3205_s15 }
 0x4fc   : > { %p47_p11 = scmp.ge.s32.totalorder %s3859_s16, 6  }
 0x4fe   :  { %49 = sbr.rel (!%p47_p11) target bundleno = 17 (0x11), region = 175 }
 0x503   :  { %2074 = vsyncpa [#allocation9], 1 }
 0x504   :  { %2076 = vsyncpa [#allocation9 + $0x1], 1 }
 0x505   :  { %2077 = vsyncpa [#allocation12], 1 }
 0x506   :  { %2078 = vsyncpa [#allocation10], 1 }
 0x507   :  { %2080 = vsyncpa [#allocation10 + $0x1], 1 }
 0x508   :  { %2081 = vsyncpa [#allocation15], 1 }

</bundles_post_ra>
